<compile_context>
chip_gen: v6e
topology: v6e:2x2x1
jax: 0.10.0
libtpu: 0.0.40
codegen_flags: <defaults>
</compile_context>

<pallas_src>
import numpy as np
import jax
import jax.numpy as jnp
from jax import lax
from jax.experimental import pallas as pl
from jax.experimental.pallas import tpu as pltpu


# ----------------------------------------------------------------------------
# Polyphase construction (matches upfirdn2d with up=factor, down=1).
# ----------------------------------------------------------------------------
def make_kernel_np(k):
    k = np.asarray(k, dtype=np.float64)
    if k.ndim == 1:
        k = k[None, :] * k[:, None]
    k = k / k.sum()
    return k


def _polyphase_taps_1d(k1d, factor, pad0):
    """Per output phase px: list of (weight, offset d) so that the 1-D
    upfirdn (up=factor, down=1) satisfies
        out[factor*c + px] = sum_t w_t * x[c + d_t]   (x == 0 outside range)."""
    K = len(k1d)
    kflip = list(k1d[::-1])
    taps = []
    for px in range(factor):
        t = []
        for j in range(K):
            if (px + j - pad0) % factor == 0:
                t.append((float(kflip[j]), (px + j - pad0) // factor))
        taps.append(t)
    return taps


def _upsample_matrix(n_in, taps, factor):
    """(n_in, n_in*factor) matrix M with (x @ M) == 1-D polyphase upsample of x.
    Boundary zero-padding is folded in by dropping out-of-range taps."""
    M = np.zeros((n_in, n_in * factor), np.float32)
    for c in range(n_in):
        for px in range(factor):
            for w, d in taps[px]:
                m = c + d
                if 0 <= m < n_in:
                    M[m, factor * c + px] += w
    return M


# ----------------------------------------------------------------------------
# Kernel
# ----------------------------------------------------------------------------
def _up2x_kernel(x_ref, mh_ref, mv_ref, o_ref, tmp_ref):
    # x_ref  : (tb*H, W)    flat stack of tb input planes
    # mh_ref : (W, OW)      horizontal polyphase matrix (right-multiply)
    # mv_ref : (OH, H)      vertical polyphase matrix (left-multiply)
    # o_ref  : (tb*OH, OW)  flat stack of tb output planes
    # tmp_ref: (tb*H, OW)   VMEM scratch holding the horizontal-pass result
    OH, H = mv_ref.shape
    tb = x_ref.shape[0] // H

    # Horizontal pass: all tb planes in a single MXU matmul (M = tb*H).
    tmp_ref[...] = jnp.dot(
        x_ref[...], mh_ref[...],
        preferred_element_type=jnp.float32).astype(tmp_ref.dtype)

    # Vertical pass: per-plane left-multiply by Mv; each plane's tile is
    # produced and stored immediately, keeping live ranges bounded.
    mv = mv_ref[...]

    def _vpass(t, carry):
        src = tmp_ref[pl.ds(pl.multiple_of(t * H, H), H), :]
        o_ref[pl.ds(pl.multiple_of(t * OH, OH), OH), :] = jnp.dot(
            mv, src, preferred_element_type=jnp.float32).astype(o_ref.dtype)
        return carry

    unroll = True if tb <= 16 else 8
    lax.fori_loop(0, tb, _vpass, 0, unroll=unroll)


# ----------------------------------------------------------------------------
# Wrapper
# ----------------------------------------------------------------------------
def _vmem_info():
    """(vmem_capacity_bytes, is_v7x); conservative fallbacks on failure."""
    kind = ""
    try:
        kind = jax.devices()[0].device_kind.lower()
    except Exception:
        pass
    is_v7x = "v7" in kind
    cap = None
    try:
        info = pltpu.get_tpu_info()
        for name in ("vmem_capacity_bytes", "vmem_size_bytes", "vmem_bytes"):
            v = getattr(info, name, None)
            if v:
                cap = int(v)
                break
    except Exception:
        cap = None
    if cap is None:
        cap = (64 if is_v7x else 128) * 1024 * 1024
    return cap, is_v7x


def _pick_tb(B, H, budget, per_tb, is_v7x):
    """Planes per grid step: as large as the VMEM budget allows, preferring a
    divisor of B (no padded garbage planes); >= 2 steps kept only on v7x."""
    tb_cap = max(1, min(B, budget // max(per_tb, 1)))
    if is_v7x and B > 1:
        tb_cap = max(1, min(tb_cap, (B + 1) // 2))

    def ok(t):
        # Second-minor block dims (t*H in, t*2H out) must be 8-aligned unless
        # the block spans the whole (padded) array.
        return t == B or (t * H) % 8 == 0

    best_div = 0
    for cand in range(tb_cap, 0, -1):
        if B % cand == 0 and ok(cand):
            best_div = cand
            break
    if best_div > 0 and best_div * 2 >= tb_cap:
        return best_div
    for cand in range(tb_cap, 0, -1):   # otherwise pad the batch
        if ok(cand):
            return cand
    return B                            # fallback: single full-batch block


def build_upsample(kernel_1d, factor=2, single_buffer_consts=True):
    """Returns fn: x (N,C,H,W) -> (N,C,H*factor,W*factor), matching
    UpsampleKernel.forward (upfirdn2d with up=factor, down=1)."""
    k1 = np.asarray(kernel_1d, np.float64)
    assert k1.ndim == 1, "separable 1-D blur kernels only"
    kernel2d = make_kernel_np(k1) * (factor ** 2)      # == UpsampleKernel buffer
    K = int(k1.shape[0])
    p = K - factor
    pad0 = (p + 1) // 2 + factor - 1
    pad1 = p // 2
    kn = (k1 / k1.sum()) * factor                      # per-axis 1-D kernel
    taps = _polyphase_taps_1d(kn, factor, pad0)

    vmem_cap, is_v7x = _vmem_info()
    vmem_limit = min(vmem_cap * 3 // 4, 96 * 1024 * 1024)

    def _const_spec(shape):
        # Mh/Mv never change across grid steps -> single buffer if supported.
        if single_buffer_consts:
            try:
                return pl.BlockSpec(shape, lambda b: (0, 0),
                                    pipeline_mode=pl.Buffered(1))
            except Exception:
                pass
        return pl.BlockSpec(shape, lambda b: (0, 0))

    def upsample(x):
        N, C, H, W = x.shape
        OH, OW = H * factor, W * factor
        B = N * C
        cdt = jnp.bfloat16 if x.dtype == jnp.bfloat16 else jnp.float32
        isz = jnp.dtype(cdt).itemsize

        Mh = _upsample_matrix(W, taps, factor)             # (W, OW)  right-mul
        Mv = _upsample_matrix(H, taps, factor).T.copy()    # (OH, H)  left-mul

        def _rup(a, m):
            return ((a + m - 1) // m) * m

        # ---- planes-per-step from the generation-aware VMEM budget.
        lane_w, lane_ow = _rup(W, 128), _rup(OW, 128)
        per_tb = (H * lane_w + OH * lane_ow) * 2 * isz     # x/out, double-buffered
        per_tb += H * lane_ow * isz                        # tmp scratch
        const_buf = 1 if single_buffer_consts else 2
        const_bytes = (_rup(W, 8) * lane_ow
                       + _rup(OH, 8) * _rup(H, 128)) * isz * const_buf
        budget = vmem_limit - const_bytes - 2 * 1024 * 1024
        budget = min(budget, 64 * 1024 * 1024)             # per-step block cap
        tb = _pick_tb(B, H, budget, per_tb, is_v7x)
        nsteps = (B + tb - 1) // tb
        Bpad = nsteps * tb

        # Flat (rows, lanes) slabs: free row-major reshapes, 2-D blocks only.
        xb = x.reshape(B * H, W).astype(cdt)
        if Bpad != B:
            xb = jnp.pad(xb, ((0, (Bpad - B) * H), (0, 0)))

        flops = int(2 * Bpad * OW * (H * W + OH * H))
        bytes_accessed = int(isz * (Bpad * H * W + Bpad * OH * OW
                                    + W * OW + OH * H))

        out = pl.pallas_call(
            _up2x_kernel,
            out_shape=jax.ShapeDtypeStruct((Bpad * OH, OW), cdt),
            grid=(nsteps,),
            in_specs=[
                pl.BlockSpec((tb * H, W), lambda b: (b, 0)),
                _const_spec((W, OW)),
                _const_spec((OH, H)),
            ],
            out_specs=pl.BlockSpec((tb * OH, OW), lambda b: (b, 0)),
            scratch_shapes=[pltpu.VMEM((tb * H, OW), cdt)],
            compiler_params=pltpu.CompilerParams(
                dimension_semantics=("parallel",),
                vmem_limit_bytes=int(vmem_limit),
            ),
            cost_estimate=pl.CostEstimate(
                flops=flops, transcendentals=0, bytes_accessed=bytes_accessed),
        )(xb, jnp.asarray(Mh, cdt), jnp.asarray(Mv, cdt))

        return out[:B * OH].reshape(N, C, OH, OW).astype(x.dtype)

    return jax.jit(upsample), (np.asarray(kernel2d, np.float32), pad0, pad1, factor)


# ----------------------------------------------------------------------------
# Reference (NumPy port of upfirdn2d_native; up=up, down=1, non-negative pads)
# ----------------------------------------------------------------------------
def reference_upsample_np(x, kernel2d, pad0, pad1, up):
    x = np.asarray(x, np.float64)
    N, C, H, W = x.shape
    kh, kw = kernel2d.shape
    u = np.zeros((N, C, H * up, W * up), np.float64)
    u[:, :, ::up, ::up] = x
    P = np.pad(u, ((0, 0), (0, 0), (pad0, pad1), (pad0, pad1)))
    wf = np.asarray(kernel2d, np.float64)[::-1, ::-1]
    OH, OW = H * up, W * up
    out = np.zeros((N, C, OH, OW), np.float64)
    for i in range(kh):
        for j in range(kw):
            out = out + wf[i, j] * P[:, :, i:i + OH, j:j + OW]
    return out.astype(np.float32)


if __name__ == "__main__":
    # StyleGAN-style blur kernel [1, 3, 3, 1], factor=2 (the Generator's upscale2x).
    key = jax.random.PRNGKey(0)
    x = jax.random.normal(key, (2, 4, 16, 16), dtype=jnp.float32)

    out = None
    kernel2d = pad0 = pad1 = factor = None
    for single_buffer in (True, False):
        try:
            upsample_fn, (kernel2d, pad0, pad1, factor) = build_upsample(
                [1, 3, 3, 1], factor=2, single_buffer_consts=single_buffer)
            out = jax.block_until_ready(upsample_fn(x))
            break
        except Exception:
            if not single_buffer:
                raise
    assert out.shape == (2, 4, 32, 32), out.shape

    ref = reference_upsample_np(np.asarray(x), kernel2d, pad0, pad1, factor)
    np.testing.assert_allclose(np.asarray(out), ref, rtol=1e-4, atol=1e-4)
    print("KERNEL_OK")
</pallas_src>

<mosaic_0001>
module attributes {stable_mosaic.version = 11 : i64} {
  func.func @_up2x_kernel(%arg0: i32, %arg1: memref<128x16xf32, #tpu.memory_space<vmem>>, %arg2: memref<16x32xf32, #tpu.memory_space<vmem>>, %arg3: memref<32x16xf32, #tpu.memory_space<vmem>>, %arg4: memref<256x32xf32, #tpu.memory_space<vmem>>, %arg5: memref<128x32xf32, #tpu.memory_space<vmem>>) attributes {dimension_semantics = [#tpu.dimension_semantics<parallel>], iteration_bounds = array<i64: 1>, scalar_prefetch = 0 : i64, scratch_operands = 1 : i64, tpu.core_type = #tpu.core_type<tc>, window_params = [{transform_indices = @transform_0, window_bounds = array<i64: 128, 16>}, {pipeline_mode = #tpu.pipeline_mode<synchronous>, transform_indices = @transform_1, window_bounds = array<i64: 16, 32>}, {pipeline_mode = #tpu.pipeline_mode<synchronous>, transform_indices = @transform_2, window_bounds = array<i64: 32, 16>}, {transform_indices = @transform_3, window_bounds = array<i64: 256, 32>}]} {
    %c0 = arith.constant 0 : index
    %c0_0 = arith.constant 0 : index
    %0 = vector.load %arg1[%c0, %c0_0] : memref<128x16xf32, #tpu.memory_space<vmem>>, vector<128x16xf32>
    %c0_1 = arith.constant 0 : index
    %c0_2 = arith.constant 0 : index
    %1 = vector.load %arg2[%c0_1, %c0_2] : memref<16x32xf32, #tpu.memory_space<vmem>>, vector<16x32xf32>
    %cst = arith.constant dense<0.000000e+00> : vector<128x32xf32>
    %2 = tpu.matmul %0, %1, %cst {dimension_numbers = #tpu.dot_dimension_numbers<[1], [0], [0], [1], [0, 0, 1, 1], [], []>} : vector<128x16xf32>, vector<16x32xf32>, vector<128x32xf32> -> vector<128x32xf32>
    %c0_3 = arith.constant 0 : index
    %c0_4 = arith.constant 0 : index
    %3 = vector.load %arg5[%c0_3, %c0_4] : memref<128x32xf32, #tpu.memory_space<vmem>>, vector<128x32xf32>
    tpu.vector_store %arg5[%c0_3, %c0_4], %2 {strides = array<i32>} : memref<128x32xf32, #tpu.memory_space<vmem>>, vector<128x32xf32>,
    %c0_5 = arith.constant 0 : index
    %c0_6 = arith.constant 0 : index
    %4 = vector.load %arg3[%c0_5, %c0_6] : memref<32x16xf32, #tpu.memory_space<vmem>>, vector<32x16xf32>
    %c0_i32 = arith.constant 0 : i32
    %c16_i32 = arith.constant 16 : i32
    %5 = arith.muli %c0_i32, %c16_i32 : i32
    %6 = tpu.assume_multiple %5, 16 : i32
    %7 = arith.index_cast %6 : i32 to index
    %c0_7 = arith.constant 0 : index
    %8 = vector.load %arg5[%7, %c0_7] : memref<128x32xf32, #tpu.memory_space<vmem>>, vector<16x32xf32>
    %cst_8 = arith.constant dense<0.000000e+00> : vector<32x32xf32>
    %9 = tpu.matmul %4, %8, %cst_8 {dimension_numbers = #tpu.dot_dimension_numbers<[1], [0], [0], [1], [0, 0, 1, 1], [], []>} : vector<32x16xf32>, vector<16x32xf32>, vector<32x32xf32> -> vector<32x32xf32>
    %c32_i32 = arith.constant 32 : i32
    %10 = arith.muli %c0_i32, %c32_i32 : i32
    %11 = tpu.assume_multiple %10, 32 : i32
    %12 = arith.index_cast %11 : i32 to index
    %c0_9 = arith.constant 0 : index
    %13 = vector.load %arg4[%12, %c0_9] : memref<256x32xf32, #tpu.memory_space<vmem>>, vector<32x32xf32>
    tpu.vector_store %arg4[%12, %c0_9], %9 {strides = array<i32>} : memref<256x32xf32, #tpu.memory_space<vmem>>, vector<32x32xf32>,
    %c1_i32 = arith.constant 1 : i32
    %c16_i32_10 = arith.constant 16 : i32
    %14 = arith.muli %c1_i32, %c16_i32_10 : i32
    %15 = tpu.assume_multiple %14, 16 : i32
    %16 = arith.index_cast %15 : i32 to index
    %c0_11 = arith.constant 0 : index
    %17 = vector.load %arg5[%16, %c0_11] : memref<128x32xf32, #tpu.memory_space<vmem>>, vector<16x32xf32>
    %cst_12 = arith.constant dense<0.000000e+00> : vector<32x32xf32>
    %18 = tpu.matmul %4, %17, %cst_12 {dimension_numbers = #tpu.dot_dimension_numbers<[1], [0], [0], [1], [0, 0, 1, 1], [], []>} : vector<32x16xf32>, vector<16x32xf32>, vector<32x32xf32> -> vector<32x32xf32>
    %c32_i32_13 = arith.constant 32 : i32
    %19 = arith.muli %c1_i32, %c32_i32_13 : i32
    %20 = tpu.assume_multiple %19, 32 : i32
    %21 = arith.index_cast %20 : i32 to index
    %c0_14 = arith.constant 0 : index
    %22 = vector.load %arg4[%21, %c0_14] : memref<256x32xf32, #tpu.memory_space<vmem>>, vector<32x32xf32>
    tpu.vector_store %arg4[%21, %c0_14], %18 {strides = array<i32>} : memref<256x32xf32, #tpu.memory_space<vmem>>, vector<32x32xf32>,
    %c2_i32 = arith.constant 2 : i32
    %c16_i32_15 = arith.constant 16 : i32
    %23 = arith.muli %c2_i32, %c16_i32_15 : i32
    %24 = tpu.assume_multiple %23, 16 : i32
    %25 = arith.index_cast %24 : i32 to index
    %c0_16 = arith.constant 0 : index
    %26 = vector.load %arg5[%25, %c0_16] : memref<128x32xf32, #tpu.memory_space<vmem>>, vector<16x32xf32>
    %cst_17 = arith.constant dense<0.000000e+00> : vector<32x32xf32>
    %27 = tpu.matmul %4, %26, %cst_17 {dimension_numbers = #tpu.dot_dimension_numbers<[1], [0], [0], [1], [0, 0, 1, 1], [], []>} : vector<32x16xf32>, vector<16x32xf32>, vector<32x32xf32> -> vector<32x32xf32>
    %c32_i32_18 = arith.constant 32 : i32
    %28 = arith.muli %c2_i32, %c32_i32_18 : i32
    %29 = tpu.assume_multiple %28, 32 : i32
    %30 = arith.index_cast %29 : i32 to index
    %c0_19 = arith.constant 0 : index
    %31 = vector.load %arg4[%30, %c0_19] : memref<256x32xf32, #tpu.memory_space<vmem>>, vector<32x32xf32>
    tpu.vector_store %arg4[%30, %c0_19], %27 {strides = array<i32>} : memref<256x32xf32, #tpu.memory_space<vmem>>, vector<32x32xf32>,
    %c3_i32 = arith.constant 3 : i32
    %c16_i32_20 = arith.constant 16 : i32
    %32 = arith.muli %c3_i32, %c16_i32_20 : i32
    %33 = tpu.assume_multiple %32, 16 : i32
    %34 = arith.index_cast %33 : i32 to index
    %c0_21 = arith.constant 0 : index
    %35 = vector.load %arg5[%34, %c0_21] : memref<128x32xf32, #tpu.memory_space<vmem>>, vector<16x32xf32>
    %cst_22 = arith.constant dense<0.000000e+00> : vector<32x32xf32>
    %36 = tpu.matmul %4, %35, %cst_22 {dimension_numbers = #tpu.dot_dimension_numbers<[1], [0], [0], [1], [0, 0, 1, 1], [], []>} : vector<32x16xf32>, vector<16x32xf32>, vector<32x32xf32> -> vector<32x32xf32>
    %c32_i32_23 = arith.constant 32 : i32
    %37 = arith.muli %c3_i32, %c32_i32_23 : i32
    %38 = tpu.assume_multiple %37, 32 : i32
    %39 = arith.index_cast %38 : i32 to index
    %c0_24 = arith.constant 0 : index
    %40 = vector.load %arg4[%39, %c0_24] : memref<256x32xf32, #tpu.memory_space<vmem>>, vector<32x32xf32>
    tpu.vector_store %arg4[%39, %c0_24], %36 {strides = array<i32>} : memref<256x32xf32, #tpu.memory_space<vmem>>, vector<32x32xf32>,
    %c4_i32 = arith.constant 4 : i32
    %c16_i32_25 = arith.constant 16 : i32
    %41 = arith.muli %c4_i32, %c16_i32_25 : i32
    %42 = tpu.assume_multiple %41, 16 : i32
    %43 = arith.index_cast %42 : i32 to index
    %c0_26 = arith.constant 0 : index
    %44 = vector.load %arg5[%43, %c0_26] : memref<128x32xf32, #tpu.memory_space<vmem>>, vector<16x32xf32>
    %cst_27 = arith.constant dense<0.000000e+00> : vector<32x32xf32>
    %45 = tpu.matmul %4, %44, %cst_27 {dimension_numbers = #tpu.dot_dimension_numbers<[1], [0], [0], [1], [0, 0, 1, 1], [], []>} : vector<32x16xf32>, vector<16x32xf32>, vector<32x32xf32> -> vector<32x32xf32>
    %c32_i32_28 = arith.constant 32 : i32
    %46 = arith.muli %c4_i32, %c32_i32_28 : i32
    %47 = tpu.assume_multiple %46, 32 : i32
    %48 = arith.index_cast %47 : i32 to index
    %c0_29 = arith.constant 0 : index
    %49 = vector.load %arg4[%48, %c0_29] : memref<256x32xf32, #tpu.memory_space<vmem>>, vector<32x32xf32>
    tpu.vector_store %arg4[%48, %c0_29], %45 {strides = array<i32>} : memref<256x32xf32, #tpu.memory_space<vmem>>, vector<32x32xf32>,
    %c5_i32 = arith.constant 5 : i32
    %c16_i32_30 = arith.constant 16 : i32
    %50 = arith.muli %c5_i32, %c16_i32_30 : i32
    %51 = tpu.assume_multiple %50, 16 : i32
    %52 = arith.index_cast %51 : i32 to index
    %c0_31 = arith.constant 0 : index
    %53 = vector.load %arg5[%52, %c0_31] : memref<128x32xf32, #tpu.memory_space<vmem>>, vector<16x32xf32>
    %cst_32 = arith.constant dense<0.000000e+00> : vector<32x32xf32>
    %54 = tpu.matmul %4, %53, %cst_32 {dimension_numbers = #tpu.dot_dimension_numbers<[1], [0], [0], [1], [0, 0, 1, 1], [], []>} : vector<32x16xf32>, vector<16x32xf32>, vector<32x32xf32> -> vector<32x32xf32>
    %c32_i32_33 = arith.constant 32 : i32
    %55 = arith.muli %c5_i32, %c32_i32_33 : i32
    %56 = tpu.assume_multiple %55, 32 : i32
    %57 = arith.index_cast %56 : i32 to index
    %c0_34 = arith.constant 0 : index
    %58 = vector.load %arg4[%57, %c0_34] : memref<256x32xf32, #tpu.memory_space<vmem>>, vector<32x32xf32>
    tpu.vector_store %arg4[%57, %c0_34], %54 {strides = array<i32>} : memref<256x32xf32, #tpu.memory_space<vmem>>, vector<32x32xf32>,
    %c6_i32 = arith.constant 6 : i32
    %c16_i32_35 = arith.constant 16 : i32
    %59 = arith.muli %c6_i32, %c16_i32_35 : i32
    %60 = tpu.assume_multiple %59, 16 : i32
    %61 = arith.index_cast %60 : i32 to index
    %c0_36 = arith.constant 0 : index
    %62 = vector.load %arg5[%61, %c0_36] : memref<128x32xf32, #tpu.memory_space<vmem>>, vector<16x32xf32>
    %cst_37 = arith.constant dense<0.000000e+00> : vector<32x32xf32>
    %63 = tpu.matmul %4, %62, %cst_37 {dimension_numbers = #tpu.dot_dimension_numbers<[1], [0], [0], [1], [0, 0, 1, 1], [], []>} : vector<32x16xf32>, vector<16x32xf32>, vector<32x32xf32> -> vector<32x32xf32>
    %c32_i32_38 = arith.constant 32 : i32
    %64 = arith.muli %c6_i32, %c32_i32_38 : i32
    %65 = tpu.assume_multiple %64, 32 : i32
    %66 = arith.index_cast %65 : i32 to index
    %c0_39 = arith.constant 0 : index
    %67 = vector.load %arg4[%66, %c0_39] : memref<256x32xf32, #tpu.memory_space<vmem>>, vector<32x32xf32>
    tpu.vector_store %arg4[%66, %c0_39], %63 {strides = array<i32>} : memref<256x32xf32, #tpu.memory_space<vmem>>, vector<32x32xf32>,
    %c7_i32 = arith.constant 7 : i32
    %c16_i32_40 = arith.constant 16 : i32
    %68 = arith.muli %c7_i32, %c16_i32_40 : i32
    %69 = tpu.assume_multiple %68, 16 : i32
    %70 = arith.index_cast %69 : i32 to index
    %c0_41 = arith.constant 0 : index
    %71 = vector.load %arg5[%70, %c0_41] : memref<128x32xf32, #tpu.memory_space<vmem>>, vector<16x32xf32>
    %cst_42 = arith.constant dense<0.000000e+00> : vector<32x32xf32>
    %72 = tpu.matmul %4, %71, %cst_42 {dimension_numbers = #tpu.dot_dimension_numbers<[1], [0], [0], [1], [0, 0, 1, 1], [], []>} : vector<32x16xf32>, vector<16x32xf32>, vector<32x32xf32> -> vector<32x32xf32>
    %c32_i32_43 = arith.constant 32 : i32
    %73 = arith.muli %c7_i32, %c32_i32_43 : i32
    %74 = tpu.assume_multiple %73, 32 : i32
    %75 = arith.index_cast %74 : i32 to index
    %c0_44 = arith.constant 0 : index
    %76 = vector.load %arg4[%75, %c0_44] : memref<256x32xf32, #tpu.memory_space<vmem>>, vector<32x32xf32>
    tpu.vector_store %arg4[%75, %c0_44], %72 {strides = array<i32>} : memref<256x32xf32, #tpu.memory_space<vmem>>, vector<32x32xf32>,
    %c8_i32 = arith.constant 8 : i32
    return
  }
  func.func @transform_0(%arg0: i32) -> (i32, i32) {
    %c0_i32 = arith.constant 0 : i32
    %c0_i32_0 = arith.constant 0 : i32
    return %arg0, %c0_i32 : i32, i32
  }
  func.func @transform_1(%arg0: i32) -> (i32, i32) {
    %c0_i32 = arith.constant 0 : i32
    %c0_i32_0 = arith.constant 0 : i32
    %c0_i32_1 = arith.constant 0 : i32
    return %c0_i32, %c0_i32_0 : i32, i32
  }
  func.func @transform_2(%arg0: i32) -> (i32, i32) {
    %c0_i32 = arith.constant 0 : i32
    %c0_i32_0 = arith.constant 0 : i32
    %c0_i32_1 = arith.constant 0 : i32
    return %c0_i32, %c0_i32_0 : i32, i32
  }
  func.func @transform_3(%arg0: i32) -> (i32, i32) {
    %c0_i32 = arith.constant 0 : i32
    %c0_i32_0 = arith.constant 0 : i32
    return %arg0, %c0_i32 : i32, i32
  }
}

module attributes {stable_mosaic.version = 11 : i64} {
  func.func @_up2x_kernel(%arg0: i32, %arg1: memref<128x16xf32, #tpu.memory_space<vmem>>, %arg2: memref<16x32xf32, #tpu.memory_space<vmem>>, %arg3: memref<32x16xf32, #tpu.memory_space<vmem>>, %arg4: memref<256x32xf32, #tpu.memory_space<vmem>>, %arg5: memref<128x32xf32, #tpu.memory_space<vmem>>) attributes {dimension_semantics = [#tpu.dimension_semantics<parallel>], iteration_bounds = array<i64: 1>, scalar_prefetch = 0 : i64, scratch_operands = 1 : i64, tpu.core_type = #tpu.core_type<tc>, window_params = [{transform_indices = @transform_0, window_bounds = array<i64: 128, 16>}, {pipeline_mode = #tpu.pipeline_mode<synchronous>, transform_indices = @transform_1, window_bounds = array<i64: 16, 32>}, {pipeline_mode = #tpu.pipeline_mode<synchronous>, transform_indices = @transform_2, window_bounds = array<i64: 32, 16>}, {transform_indices = @transform_3, window_bounds = array<i64: 256, 32>}]} {
    %c0 = arith.constant 0 : index
    %c0_0 = arith.constant 0 : index
    %0 = vector.load %arg1[%c0, %c0_0] : memref<128x16xf32, #tpu.memory_space<vmem>>, vector<128x16xf32>
    %c0_1 = arith.constant 0 : index
    %c0_2 = arith.constant 0 : index
    %1 = vector.load %arg2[%c0_1, %c0_2] : memref<16x32xf32, #tpu.memory_space<vmem>>, vector<16x32xf32>
    %cst = arith.constant dense<0.000000e+00> : vector<128x32xf32>
    %2 = tpu.matmul %0, %1, %cst {dimension_numbers = #tpu.dot_dimension_numbers<[1], [0], [0], [1], [0, 0, 1, 1], [], []>} : vector<128x16xf32>, vector<16x32xf32>, vector<128x32xf32> -> vector<128x32xf32>
    %c0_3 = arith.constant 0 : index
    %c0_4 = arith.constant 0 : index
    %3 = vector.load %arg5[%c0_3, %c0_4] : memref<128x32xf32, #tpu.memory_space<vmem>>, vector<128x32xf32>
    tpu.vector_store %arg5[%c0_3, %c0_4], %2 {strides = array<i32>} : memref<128x32xf32, #tpu.memory_space<vmem>>, vector<128x32xf32>,
    %c0_5 = arith.constant 0 : index
    %c0_6 = arith.constant 0 : index
    %4 = vector.load %arg3[%c0_5, %c0_6] : memref<32x16xf32, #tpu.memory_space<vmem>>, vector<32x16xf32>
    %c0_i32 = arith.constant 0 : i32
    %c16_i32 = arith.constant 16 : i32
    %5 = arith.muli %c0_i32, %c16_i32 : i32
    %6 = tpu.assume_multiple %5, 16 : i32
    %7 = arith.index_cast %6 : i32 to index
    %c0_7 = arith.constant 0 : index
    %8 = vector.load %arg5[%7, %c0_7] : memref<128x32xf32, #tpu.memory_space<vmem>>, vector<16x32xf32>
    %cst_8 = arith.constant dense<0.000000e+00> : vector<32x32xf32>
    %9 = tpu.matmul %4, %8, %cst_8 {dimension_numbers = #tpu.dot_dimension_numbers<[1], [0], [0], [1], [0, 0, 1, 1], [], []>} : vector<32x16xf32>, vector<16x32xf32>, vector<32x32xf32> -> vector<32x32xf32>
    %c32_i32 = arith.constant 32 : i32
    %10 = arith.muli %c0_i32, %c32_i32 : i32
    %11 = tpu.assume_multiple %10, 32 : i32
    %12 = arith.index_cast %11 : i32 to index
    %c0_9 = arith.constant 0 : index
    %13 = vector.load %arg4[%12, %c0_9] : memref<256x32xf32, #tpu.memory_space<vmem>>, vector<32x32xf32>
    tpu.vector_store %arg4[%12, %c0_9], %9 {strides = array<i32>} : memref<256x32xf32, #tpu.memory_space<vmem>>, vector<32x32xf32>,
    %c1_i32 = arith.constant 1 : i32
    %c16_i32_10 = arith.constant 16 : i32
    %14 = arith.muli %c1_i32, %c16_i32_10 : i32
    %15 = tpu.assume_multiple %14, 16 : i32
    %16 = arith.index_cast %15 : i32 to index
    %c0_11 = arith.constant 0 : index
    %17 = vector.load %arg5[%16, %c0_11] : memref<128x32xf32, #tpu.memory_space<vmem>>, vector<16x32xf32>
    %cst_12 = arith.constant dense<0.000000e+00> : vector<32x32xf32>
    %18 = tpu.matmul %4, %17, %cst_12 {dimension_numbers = #tpu.dot_dimension_numbers<[1], [0], [0], [1], [0, 0, 1, 1], [], []>} : vector<32x16xf32>, vector<16x32xf32>, vector<32x32xf32> -> vector<32x32xf32>
    %c32_i32_13 = arith.constant 32 : i32
    %19 = arith.muli %c1_i32, %c32_i32_13 : i32
    %20 = tpu.assume_multiple %19, 32 : i32
    %21 = arith.index_cast %20 : i32 to index
    %c0_14 = arith.constant 0 : index
    %22 = vector.load %arg4[%21, %c0_14] : memref<256x32xf32, #tpu.memory_space<vmem>>, vector<32x32xf32>
    tpu.vector_store %arg4[%21, %c0_14], %18 {strides = array<i32>} : memref<256x32xf32, #tpu.memory_space<vmem>>, vector<32x32xf32>,
    %c2_i32 = arith.constant 2 : i32
    %c16_i32_15 = arith.constant 16 : i32
    %23 = arith.muli %c2_i32, %c16_i32_15 : i32
    %24 = tpu.assume_multiple %23, 16 : i32
    %25 = arith.index_cast %24 : i32 to index
    %c0_16 = arith.constant 0 : index
    %26 = vector.load %arg5[%25, %c0_16] : memref<128x32xf32, #tpu.memory_space<vmem>>, vector<16x32xf32>
    %cst_17 = arith.constant dense<0.000000e+00> : vector<32x32xf32>
    %27 = tpu.matmul %4, %26, %cst_17 {dimension_numbers = #tpu.dot_dimension_numbers<[1], [0], [0], [1], [0, 0, 1, 1], [], []>} : vector<32x16xf32>, vector<16x32xf32>, vector<32x32xf32> -> vector<32x32xf32>
    %c32_i32_18 = arith.constant 32 : i32
    %28 = arith.muli %c2_i32, %c32_i32_18 : i32
    %29 = tpu.assume_multiple %28, 32 : i32
    %30 = arith.index_cast %29 : i32 to index
    %c0_19 = arith.constant 0 : index
    %31 = vector.load %arg4[%30, %c0_19] : memref<256x32xf32, #tpu.memory_space<vmem>>, vector<32x32xf32>
    tpu.vector_store %arg4[%30, %c0_19], %27 {strides = array<i32>} : memref<256x32xf32, #tpu.memory_space<vmem>>, vector<32x32xf32>,
    %c3_i32 = arith.constant 3 : i32
    %c16_i32_20 = arith.constant 16 : i32
    %32 = arith.muli %c3_i32, %c16_i32_20 : i32
    %33 = tpu.assume_multiple %32, 16 : i32
    %34 = arith.index_cast %33 : i32 to index
    %c0_21 = arith.constant 0 : index
    %35 = vector.load %arg5[%34, %c0_21] : memref<128x32xf32, #tpu.memory_space<vmem>>, vector<16x32xf32>
    %cst_22 = arith.constant dense<0.000000e+00> : vector<32x32xf32>
    %36 = tpu.matmul %4, %35, %cst_22 {dimension_numbers = #tpu.dot_dimension_numbers<[1], [0], [0], [1], [0, 0, 1, 1], [], []>} : vector<32x16xf32>, vector<16x32xf32>, vector<32x32xf32> -> vector<32x32xf32>
    %c32_i32_23 = arith.constant 32 : i32
    %37 = arith.muli %c3_i32, %c32_i32_23 : i32
    %38 = tpu.assume_multiple %37, 32 : i32
    %39 = arith.index_cast %38 : i32 to index
    %c0_24 = arith.constant 0 : index
    %40 = vector.load %arg4[%39, %c0_24] : memref<256x32xf32, #tpu.memory_space<vmem>>, vector<32x32xf32>
    tpu.vector_store %arg4[%39, %c0_24], %36 {strides = array<i32>} : memref<256x32xf32, #tpu.memory_space<vmem>>, vector<32x32xf32>,
    %c4_i32 = arith.constant 4 : i32
    %c16_i32_25 = arith.constant 16 : i32
    %41 = arith.muli %c4_i32, %c16_i32_25 : i32
    %42 = tpu.assume_multiple %41, 16 : i32
    %43 = arith.index_cast %42 : i32 to index
    %c0_26 = arith.constant 0 : index
    %44 = vector.load %arg5[%43, %c0_26] : memref<128x32xf32, #tpu.memory_space<vmem>>, vector<16x32xf32>
    %cst_27 = arith.constant dense<0.000000e+00> : vector<32x32xf32>
    %45 = tpu.matmul %4, %44, %cst_27 {dimension_numbers = #tpu.dot_dimension_numbers<[1], [0], [0], [1], [0, 0, 1, 1], [], []>} : vector<32x16xf32>, vector<16x32xf32>, vector<32x32xf32> -> vector<32x32xf32>
    %c32_i32_28 = arith.constant 32 : i32
    %46 = arith.muli %c4_i32, %c32_i32_28 : i32
    %47 = tpu.assume_multiple %46, 32 : i32
    %48 = arith.index_cast %47 : i32 to index
    %c0_29 = arith.constant 0 : index
    %49 = vector.load %arg4[%48, %c0_29] : memref<256x32xf32, #tpu.memory_space<vmem>>, vector<32x32xf32>
    tpu.vector_store %arg4[%48, %c0_29], %45 {strides = array<i32>} : memref<256x32xf32, #tpu.memory_space<vmem>>, vector<32x32xf32>,
    %c5_i32 = arith.constant 5 : i32
    %c16_i32_30 = arith.constant 16 : i32
    %50 = arith.muli %c5_i32, %c16_i32_30 : i32
    %51 = tpu.assume_multiple %50, 16 : i32
    %52 = arith.index_cast %51 : i32 to index
    %c0_31 = arith.constant 0 : index
    %53 = vector.load %arg5[%52, %c0_31] : memref<128x32xf32, #tpu.memory_space<vmem>>, vector<16x32xf32>
    %cst_32 = arith.constant dense<0.000000e+00> : vector<32x32xf32>
    %54 = tpu.matmul %4, %53, %cst_32 {dimension_numbers = #tpu.dot_dimension_numbers<[1], [0], [0], [1], [0, 0, 1, 1], [], []>} : vector<32x16xf32>, vector<16x32xf32>, vector<32x32xf32> -> vector<32x32xf32>
    %c32_i32_33 = arith.constant 32 : i32
    %55 = arith.muli %c5_i32, %c32_i32_33 : i32
    %56 = tpu.assume_multiple %55, 32 : i32
    %57 = arith.index_cast %56 : i32 to index
    %c0_34 = arith.constant 0 : index
    %58 = vector.load %arg4[%57, %c0_34] : memref<256x32xf32, #tpu.memory_space<vmem>>, vector<32x32xf32>
    tpu.vector_store %arg4[%57, %c0_34], %54 {strides = array<i32>} : memref<256x32xf32, #tpu.memory_space<vmem>>, vector<32x32xf32>,
    %c6_i32 = arith.constant 6 : i32
    %c16_i32_35 = arith.constant 16 : i32
    %59 = arith.muli %c6_i32, %c16_i32_35 : i32
    %60 = tpu.assume_multiple %59, 16 : i32
    %61 = arith.index_cast %60 : i32 to index
    %c0_36 = arith.constant 0 : index
    %62 = vector.load %arg5[%61, %c0_36] : memref<128x32xf32, #tpu.memory_space<vmem>>, vector<16x32xf32>
    %cst_37 = arith.constant dense<0.000000e+00> : vector<32x32xf32>
    %63 = tpu.matmul %4, %62, %cst_37 {dimension_numbers = #tpu.dot_dimension_numbers<[1], [0], [0], [1], [0, 0, 1, 1], [], []>} : vector<32x16xf32>, vector<16x32xf32>, vector<32x32xf32> -> vector<32x32xf32>
    %c32_i32_38 = arith.constant 32 : i32
    %64 = arith.muli %c6_i32, %c32_i32_38 : i32
    %65 = tpu.assume_multiple %64, 32 : i32
    %66 = arith.index_cast %65 : i32 to index
    %c0_39 = arith.constant 0 : index
    %67 = vector.load %arg4[%66, %c0_39] : memref<256x32xf32, #tpu.memory_space<vmem>>, vector<32x32xf32>
    tpu.vector_store %arg4[%66, %c0_39], %63 {strides = array<i32>} : memref<256x32xf32, #tpu.memory_space<vmem>>, vector<32x32xf32>,
    %c7_i32 = arith.constant 7 : i32
    %c16_i32_40 = arith.constant 16 : i32
    %68 = arith.muli %c7_i32, %c16_i32_40 : i32
    %69 = tpu.assume_multiple %68, 16 : i32
    %70 = arith.index_cast %69 : i32 to index
    %c0_41 = arith.constant 0 : index
    %71 = vector.load %arg5[%70, %c0_41] : memref<128x32xf32, #tpu.memory_space<vmem>>, vector<16x32xf32>
    %cst_42 = arith.constant dense<0.000000e+00> : vector<32x32xf32>
    %72 = tpu.matmul %4, %71, %cst_42 {dimension_numbers = #tpu.dot_dimension_numbers<[1], [0], [0], [1], [0, 0, 1, 1], [], []>} : vector<32x16xf32>, vector<16x32xf32>, vector<32x32xf32> -> vector<32x32xf32>
    %c32_i32_43 = arith.constant 32 : i32
    %73 = arith.muli %c7_i32, %c32_i32_43 : i32
    %74 = tpu.assume_multiple %73, 32 : i32
    %75 = arith.index_cast %74 : i32 to index
    %c0_44 = arith.constant 0 : index
    %76 = vector.load %arg4[%75, %c0_44] : memref<256x32xf32, #tpu.memory_space<vmem>>, vector<32x32xf32>
    tpu.vector_store %arg4[%75, %c0_44], %72 {strides = array<i32>} : memref<256x32xf32, #tpu.memory_space<vmem>>, vector<32x32xf32>,
    %c8_i32 = arith.constant 8 : i32
    return
  }
  func.func @transform_0(%arg0: i32) -> (i32, i32) {
    %c0_i32 = arith.constant 0 : i32
    %c0_i32_0 = arith.constant 0 : i32
    return %arg0, %c0_i32 : i32, i32
  }
  func.func @transform_1(%arg0: i32) -> (i32, i32) {
    %c0_i32 = arith.constant 0 : i32
    %c0_i32_0 = arith.constant 0 : i32
    %c0_i32_1 = arith.constant 0 : i32
    return %c0_i32, %c0_i32_0 : i32, i32
  }
  func.func @transform_2(%arg0: i32) -> (i32, i32) {
    %c0_i32 = arith.constant 0 : i32
    %c0_i32_0 = arith.constant 0 : i32
    %c0_i32_1 = arith.constant 0 : i32
    return %c0_i32, %c0_i32_0 : i32, i32
  }
  func.func @transform_3(%arg0: i32) -> (i32, i32) {
    %c0_i32 = arith.constant 0 : i32
    %c0_i32_0 = arith.constant 0 : i32
    return %arg0, %c0_i32 : i32, i32
  }
}

</mosaic_0001>

<bundles_post_ra>
// kernel: upsample.1
= control target key start
LH: loop header
LB: loop body
LE: loop exit
PB: predicated region body
PF: predicated region fallthrough
CT: control target
= control target key end

     0   :  { %8 = vsyncpa [#allocation4], 0  ;;  %s1561_s0 = inlined_call_operand.hbm [shape: f32[128,16], index: 0, kind: input, shape index: {}]   ;;  %s1562_s1 = inlined_call_operand.hbm [shape: f32[16,32], index: 1, kind: input, shape index: {}]   ;;  %s1563_s2 = inlined_call_operand.hbm [shape: f32[32,16], index: 2, kind: input, shape index: {}]   ;;  %s1564_s3 = inlined_call_operand.hbm [shape: f32[256,32], index: 3, kind: output, shape index: {}]  }
   0x1   :  { %9 = vsyncpa [#allocation7], 0 }
   0x2   :  { %10 = vsyncpa [#allocation5], 0  ;;  %s1375_s12 = smov [#allocation6]   ;;  %s1376_s14 = smov [#allocation3]  }
   0x3   :  { %s28_s13 = sshll.u32 %s1375_s12, 4  ;;  %s16_s15 = sshll.u32 %s1376_s14, 4  ;;  %s29_s13 = int_to_ptr.vmem [resolvable:$true] %s28_s13  ;;  %s17_s15 = int_to_ptr.vmem [resolvable:$true] %s16_s15 }
   0x4   :  { %s1297_s16 = scalar_lea.vmem %s29_s13, 256  ;;  %p1302_p1 = scmp.lt.s32.totalorder %s29_s13, %s29_s13 }
   0x5   :  { %p1298_p0 = scmp.ne.s32.totalorder %s29_s13, %s1297_s16  ;;  %p1303_p2 = scmp.lt.s32.totalorder %s1297_s16, %s1297_s16 }
   0x7   :  { %p1304_p3 = por %p1303_p2, %p1302_p1 }
   0x9   :  { %p1305_p4 = pnand %p1304_p3, %p1298_p0 }
   0xb   :  { %1308 = shalt.err (!%p1305_p4)
}
   0xc   :  { %s1377_s17 = smov 128   ;;  %s1378_s18 = smov 8  }
   0xd   :  { %34 = dma.hbm_to_vmem [thread:$0]  %s1562_s1, 256, %s29_s13, [#allocation7], %s1377_s17, %s1377_s17, %s1378_s18  }
   0xe   :  { %s1317_s21 = scalar_lea.vmem %s17_s15, 2048  ;;  %p1322_p6 = scmp.lt.s32.totalorder %s17_s15, %s17_s15 }
   0xf   :  { %p1318_p5 = scmp.ne.s32.totalorder %s17_s15, %s1317_s21  ;;  %p1323_p7 = scmp.lt.s32.totalorder %s1317_s21, %s1317_s21 }
  0x11   :  { %p1324_p8 = por %p1323_p7, %p1322_p6 }
  0x13   :  { %p1325_p9 = pnand %p1324_p8, %p1318_p5 }
  0x15   :  { %1328 = shalt.err (!%p1325_p9)
}
  0x16   :  { %22 = dma.hbm_to_vmem [thread:$0]  %s1561_s0, 2048, %s17_s15, [#allocation4], %s1377_s17, %s1377_s17, %s1378_s18  }
  0x17   :  { %s1379_s24 = smov [#allocation8]  }
  0x18   :  { %s40_s25 = sshll.u32 %s1379_s24, 4  ;;  %s41_s25 = int_to_ptr.vmem [resolvable:$true] %s40_s25 }
  0x19   :  { %s1337_s26 = scalar_lea.vmem %s41_s25, 512  ;;  %p1342_p11 = scmp.lt.s32.totalorder %s41_s25, %s41_s25 }
  0x1a   :  { %p1338_p10 = scmp.ne.s32.totalorder %s41_s25, %s1337_s26  ;;  %p1343_p12 = scmp.lt.s32.totalorder %s1337_s26, %s1337_s26 }
  0x1c   :  { %p1344_p13 = por %p1343_p12, %p1342_p11 }
  0x1e   :  { %p1345_p0 = pnand %p1344_p13, %p1338_p10 }
  0x20   :  { %1348 = shalt.err (!%p1345_p0)
}
  0x21   :  { %46 = dma.hbm_to_vmem [thread:$0]  %s1563_s2, 512, %s41_s25, [#allocation7], %s1377_s17, %s1377_s17, %s1378_s18  }
  0x22   :  { %1369 = dma.done.wait [#allocation4], 2048  }
  0x23   :  { %1370 = vsyncadd [#allocation4], 4294965248 }
  0x24   :  { %1371 = dma.done.wait [#allocation7], 768  }
  0x25   :  { %1372 = vsyncadd [#allocation7], 4294966528  ;;  %vm74_vm0 = vcmask 130048   ;;  %v73_v0 = vld [vmem:[#allocation6 + $0x8] sm:$0xff]  ;;  %v72_v1 = vld [vmem:[#allocation6] sm:$0xff]  ;;  %vm268_vm1 = vcmask 261120  }
  0x26   :  { %v56_v2 = vld [vmem:[#allocation3] sm:$0xff]  ;;  %1175 = vmatprep.subr.mxu0 %v73_v0  ;;  %v57_v3 = vld [vmem:[#allocation3 + $0x8] sm:$0xff]  ;;  %v58_v4 = vld [vmem:[#allocation3 + $0x10] sm:$0xff]  ;;  %s1380_s0 = smov [#allocation9]  }
  0x27   :  { %1179 = vmatprep.mubr.msk.f32.mxu0 %vm74_vm0, %v56_v2  ;;  %1176 = vmatpush3.msra.mxu0 %v73_v0  ;;  %v59_v5 = vld [vmem:[#allocation3 + $0x18] sm:$0xff]  ;;  %v60_v6 = vld [vmem:[#allocation3 + $0x20] sm:$0xff]  ;;  %v61_v7 = vld [vmem:[#allocation3 + $0x28] sm:$0xff]  ;;  %s1048_s2 = sshll.u32 %s1380_s0, 4  ;;  %s1049_s2 = int_to_ptr.vmem [resolvable:$true] %s1048_s2 }
  0x28   :  { %1177 = vmatprep.subr.mxu0 %v72_v1  ;;  %v62_v8 = vld [vmem:[#allocation3 + $0x30] sm:$0xff]  ;;  %v63_v9 = vld [vmem:[#allocation3 + $0x38] sm:$0xff]  ;;  %v64_v10 = vld [vmem:[#allocation3 + $0x40] sm:$0xff]  ;;  %s1349_s28 = scalar_lea.vmem %s1049_s2, 4096  ;;  %p1354_p2 = scmp.lt.s32.totalorder %s1049_s2, %s1049_s2 }
  0x29   :  { %1178 = vmatpush3.msra.mxu0 %v72_v1  ;;  %v65_v11 = vld [vmem:[#allocation3 + $0x48] sm:$0xff]  ;;  %v66_v12 = vld [vmem:[#allocation3 + $0x50] sm:$0xff]  ;;  %v67_v13 = vld [vmem:[#allocation3 + $0x58] sm:$0xff]  ;;  %p1350_p1 = scmp.ne.s32.totalorder %s1049_s2, %s1349_s28  ;;  %p1355_p3 = scmp.lt.s32.totalorder %s1349_s28, %s1349_s28 }
  0x2a   :  { %1180 = vmatmul.mubr.msk.f32.vlgmr.msra.gmra.mxu0 %vm74_vm0, %v57_v3  ;;  %v68_v14 = vld [vmem:[#allocation3 + $0x60] sm:$0xff]  ;;  %v69_v15 = vld [vmem:[#allocation3 + $0x68] sm:$0xff]  ;;  %v70_v16 = vld [vmem:[#allocation3 + $0x70] sm:$0xff] }
  0x2b   :  { %1182 = vmatprep.mubr.msk.f32.mxu0 %vm74_vm0, %v58_v4  ;;  %v71_v17 = vld [vmem:[#allocation3 + $0x78] sm:$0xff]  ;;  %v1435_v18 = vld [vmem:[#allocation8] sm:$0xff]  ;;  %v1449_v28 = vld [vmem:[#allocation8 + $0x10] sm:$0xff]  ;;  %p1356_p4 = por %p1355_p3, %p1354_p2 }
  0x2c   :  { %1207 = vmatprep.mubr.msk.f32.mxu1 %vm74_vm0, %v1435_v18  ;;  %v1446_v27 = vld [vmem:[#allocation8 + $0x8] sm:$0xff]  ;;  %v1456_v33 = vld [vmem:[#allocation8 + $0x18] sm:$0xff] }
  0x2d   :  { %p1357_p5 = pnand %p1356_p4, %p1350_p1 }
  0x2e   :  { %1183 = vmatmul.mubr.msk.f32.gmra.mxu0 %vm74_vm0, %v59_v5 }
  0x2f   :  { %1185 = vmatprep.mubr.msk.f32.mxu0 %vm74_vm0, %v60_v6 }
  0x32   :  { %1186 = vmatmul.mubr.msk.f32.gmra.mxu0 %vm74_vm0, %v61_v7 }
  0x33   :  { %1188 = vmatprep.mubr.msk.f32.mxu0 %vm74_vm0, %v62_v8 }
  0x36   :  { %1189 = vmatmul.mubr.msk.f32.gmra.mxu0 %vm74_vm0, %v63_v9 }
  0x37   :  { %1191 = vmatprep.mubr.msk.f32.mxu0 %vm74_vm0, %v64_v10 }
  0x3a   :  { %1192 = vmatmul.mubr.msk.f32.gmra.mxu0 %vm74_vm0, %v65_v11 }
  0x3b   :  { %1194 = vmatprep.mubr.msk.f32.mxu0 %vm74_vm0, %v66_v12 }
  0x3e   :  { %1195 = vmatmul.mubr.msk.f32.gmra.mxu0 %vm74_vm0, %v67_v13 }
  0x3f   :  { %1197 = vmatprep.mubr.msk.f32.mxu0 %vm74_vm0, %v68_v14 }
  0x42   :  { %1198 = vmatmul.mubr.msk.f32.gmra.mxu0 %vm74_vm0, %v69_v15 }
  0x43   :  { %1200 = vmatprep.mubr.msk.f32.mxu0 %vm74_vm0, %v70_v16 }
  0x46   :  { %1201 = vmatmul.mubr.msk.f32.gmra.mxu0 %vm74_vm0, %v71_v17 }
  0x47   :  { %1247 = vmatprep.mubr.msk.f32.mxu0 %vm74_vm0, %v1435_v18 }
  0xea   :  { %v1181_v19 = vpop.f32.mrf.mxu0 }
  0xeb   :  { %270 = vst.msk [vmem:[#allocation2 + $0x8] sm:$0xff] %vm268_vm1, %v1181_v19 }
  0xec   :  { %v189_v20 = vpop.f32.mrf.mxu0 }
  0xed   :  { %269 = vst.msk [vmem:[#allocation2] sm:$0xff] %vm268_vm1, %v189_v20 }
  0xee   :  { %v1184_v21 = vpop.f32.mrf.mxu0 }
  0xef   :  { %272 = vst.msk [vmem:[#allocation2 + $0x18] sm:$0xff] %vm268_vm1, %v1184_v21 }
  0xf0   :  { %v199_v22 = vpop.f32.mrf.mxu0 }
  0xf1   :  { %271 = vst.msk [vmem:[#allocation2 + $0x10] sm:$0xff] %vm268_vm1, %v199_v22 }
  0xf2   :  { %v1187_v23 = vpop.f32.mrf.mxu0  ;;  %v290_v24 = vld [vmem:[#allocation2 + $0x8] sm:$0xff] }
  0xf3   :  { %274 = vst.msk [vmem:[#allocation2 + $0x28] sm:$0xff] %vm268_vm1, %v1187_v23  ;;  %1203 = vmatprep.subr.mxu1 %v290_v24 }
  0xf4   :  { %v209_v25 = vpop.f32.mrf.mxu0  ;;  %1204 = vmatpush3.msra.mxu1 %v290_v24  ;;  %v289_v26 = vld [vmem:[#allocation2] sm:$0xff] }
  0xf5   :  { %273 = vst.msk [vmem:[#allocation2 + $0x20] sm:$0xff] %vm268_vm1, %v209_v25  ;;  %1205 = vmatprep.subr.mxu1 %v289_v26 }
  0xf6   :  { %v1190_v29 = vpop.f32.mrf.mxu0  ;;  %1206 = vmatpush3.msra.mxu1 %v289_v26  ;;  %v394_v30 = vld [vmem:[#allocation2 + $0x18] sm:$0xff] }
  0xf7   :  { %276 = vst.msk [vmem:[#allocation2 + $0x38] sm:$0xff] %vm268_vm1, %v1190_v29  ;;  %1208 = vmatmul.mubr.msk.f32.vlgmr.msra.gmra.mxu1 %vm74_vm0, %v1446_v27  ;;  %1213 = vmatprep.subr.mxu1 %v394_v30 }
  0xf8   :  { %v219_v31 = vpop.f32.mrf.mxu0  ;;  %1214 = vmatpush3.msra.mxu1 %v394_v30  ;;  %v393_v32 = vld [vmem:[#allocation2 + $0x10] sm:$0xff]  ;;  %1210 = vmatprep.mubr.msk.f32.mxu1 %vm74_vm0, %v1449_v28 }
  0xf9   :  { %275 = vst.msk [vmem:[#allocation2 + $0x30] sm:$0xff] %vm268_vm1, %v219_v31  ;;  %1215 = vmatprep.subr.mxu1 %v393_v32 }
  0xfa   :  { %v1193_v34 = vpop.f32.mrf.mxu0  ;;  %1216 = vmatpush3.msra.mxu1 %v393_v32  ;;  %v487_v35 = vld [vmem:[#allocation2 + $0x28] sm:$0xff] }
  0xfb   :  { %278 = vst.msk [vmem:[#allocation2 + $0x48] sm:$0xff] %vm268_vm1, %v1193_v34  ;;  %1211 = vmatmul.mubr.msk.f32.gmra.mxu1 %vm74_vm0, %v1456_v33  ;;  %1223 = vmatprep.subr.mxu1 %v487_v35 }
  0xfc   :  { %v229_v36 = vpop.f32.mrf.mxu0  ;;  %1217 = vmatprep.mubr.msk.f32.mxu1 %vm74_vm0, %v1435_v18  ;;  %v486_v37 = vld [vmem:[#allocation2 + $0x20] sm:$0xff] }
  0xfd   :  { %277 = vst.msk [vmem:[#allocation2 + $0x40] sm:$0xff] %vm268_vm1, %v229_v36 }
  0xfe   :  { %v1196_v38 = vpop.f32.mrf.mxu0  ;;  %v580_v39 = vld [vmem:[#allocation2 + $0x38] sm:$0xff] }
  0xff   :  { %1218 = vmatmul.mubr.msk.f32.vlgmr.msra.gmra.mxu1 %vm74_vm0, %v1446_v27  ;;  %280 = vst.msk [vmem:[#allocation2 + $0x58] sm:$0xff] %vm268_vm1, %v1196_v38 }
 0x100   :  { %1224 = vmatpush3.msra.mxu1 %v487_v35  ;;  %1220 = vmatprep.mubr.msk.f32.mxu1 %vm74_vm0, %v1449_v28  ;;  %v239_v40 = vpop.f32.mrf.mxu0  ;;  %v579_v45 = vld [vmem:[#allocation2 + $0x30] sm:$0xff] }
 0x101   :  { %1225 = vmatprep.subr.mxu1 %v486_v37  ;;  %279 = vst.msk [vmem:[#allocation2 + $0x50] sm:$0xff] %vm268_vm1, %v239_v40 }
 0x102   :  { %1226 = vmatpush3.msra.mxu1 %v486_v37  ;;  %v673_v41 = vld [vmem:[#allocation2 + $0x48] sm:$0xff]  ;;  %v1199_v42 = vpop.f32.mrf.mxu0 }
 0x103   :  { %1233 = vmatprep.subr.mxu1 %v580_v39  ;;  %1221 = vmatmul.mubr.msk.f32.gmra.mxu1 %vm74_vm0, %v1456_v33  ;;  %282 = vst.msk [vmem:[#allocation2 + $0x68] sm:$0xff] %vm268_vm1, %v1199_v42 }
 0x104   :  { %1243 = vmatprep.subr.mxu0 %v673_v41  ;;  %v672_v43 = vld [vmem:[#allocation2 + $0x40] sm:$0xff]  ;;  %1227 = vmatprep.mubr.msk.f32.mxu1 %vm74_vm0, %v1435_v18  ;;  %v249_v44 = vpop.f32.mrf.mxu0 }
 0x105   :  { %1244 = vmatpush3.msra.mxu0 %v673_v41  ;;  %281 = vst.msk [vmem:[#allocation2 + $0x60] sm:$0xff] %vm268_vm1, %v249_v44 }
 0x106   :  { %1245 = vmatprep.subr.mxu0 %v672_v43  ;;  %v1202_v46 = vpop.f32.mrf.mxu0  ;;  %v766_v47 = vld [vmem:[#allocation2 + $0x58] sm:$0xff] }
 0x107   :  { %1246 = vmatpush3.msra.mxu0 %v672_v43  ;;  %1228 = vmatmul.mubr.msk.f32.vlgmr.msra.gmra.mxu1 %vm74_vm0, %v1446_v27  ;;  %284 = vst.msk [vmem:[#allocation2 + $0x78] sm:$0xff] %vm268_vm1, %v1202_v46 }
 0x108   :  { %1234 = vmatpush3.msra.mxu1 %v580_v39  ;;  %1230 = vmatprep.mubr.msk.f32.mxu1 %vm74_vm0, %v1449_v28  ;;  %v259_v48 = vpop.f32.mrf.mxu0  ;;  %v765_v51 = vld [vmem:[#allocation2 + $0x50] sm:$0xff] }
 0x109   :  { %1235 = vmatprep.subr.mxu1 %v579_v45  ;;  %283 = vst.msk [vmem:[#allocation2 + $0x70] sm:$0xff] %vm268_vm1, %v259_v48  ;;  %1248 = vmatmul.mubr.msk.f32.vlgmr.msra.gmra.mxu0 %vm74_vm0, %v1446_v27 }
 0x10a   :  { %1236 = vmatpush3.msra.mxu1 %v579_v45  ;;  %v859_v49 = vld [vmem:[#allocation2 + $0x68] sm:$0xff]  ;;  %1250 = vmatprep.mubr.msk.f32.mxu0 %vm74_vm0, %v1449_v28 }
 0x10b   :  { %1231 = vmatmul.mubr.msk.f32.gmra.mxu1 %vm74_vm0, %v1456_v33  ;;  %1253 = vmatprep.subr.mxu1 %v766_v47 }
 0x10c   :  { %1237 = vmatprep.mubr.msk.f32.mxu1 %vm74_vm0, %v1435_v18  ;;  %1263 = vmatprep.subr.mxu0 %v859_v49  ;;  %v858_v50 = vld [vmem:[#allocation2 + $0x60] sm:$0xff] }
 0x10d   :  { %1264 = vmatpush3.msra.mxu0 %v859_v49 }
 0x10e   :  { %1265 = vmatprep.subr.mxu0 %v858_v50  ;;  %1251 = vmatmul.mubr.msk.f32.gmra.mxu0 %vm74_vm0, %v1456_v33  ;;  %v952_v52 = vld [vmem:[#allocation2 + $0x78] sm:$0xff] }
 0x10f   :  { %1238 = vmatmul.mubr.msk.f32.vlgmr.msra.gmra.mxu1 %vm74_vm0, %v1446_v27  ;;  %1266 = vmatpush3.msra.mxu0 %v858_v50 }
 0x110   :  { %1254 = vmatpush3.msra.mxu1 %v766_v47  ;;  %1240 = vmatprep.mubr.msk.f32.mxu1 %vm74_vm0, %v1449_v28  ;;  %v951_v53 = vld [vmem:[#allocation2 + $0x70] sm:$0xff] }
 0x111   :  { %1255 = vmatprep.subr.mxu1 %v765_v51  ;;  %1267 = vmatprep.mubr.msk.f32.mxu0 %vm74_vm0, %v1435_v18 }
 0x112   :  { %1256 = vmatpush3.msra.mxu1 %v765_v51  ;;  %1268 = vmatmul.mubr.msk.f32.vlgmr.msra.gmra.mxu0 %vm74_vm0, %v1446_v27 }
 0x113   :  { %1241 = vmatmul.mubr.msk.f32.gmra.mxu1 %vm74_vm0, %v1456_v33  ;;  %1273 = vmatprep.subr.mxu1 %v952_v52 }
 0x114   :  { %1257 = vmatprep.mubr.msk.f32.mxu1 %vm74_vm0, %v1435_v18  ;;  %1270 = vmatprep.mubr.msk.f32.mxu0 %vm74_vm0, %v1449_v28 }
 0x116   :  { %1271 = vmatmul.mubr.msk.f32.gmra.mxu0 %vm74_vm0, %v1456_v33 }
 0x117   :  { %1258 = vmatmul.mubr.msk.f32.vlgmr.msra.gmra.mxu1 %vm74_vm0, %v1446_v27 }
 0x118   :  { %1274 = vmatpush3.msra.mxu1 %v952_v52  ;;  %1260 = vmatprep.mubr.msk.f32.mxu1 %vm74_vm0, %v1449_v28 }
 0x119   :  { %1275 = vmatprep.subr.mxu1 %v951_v53 }
 0x11a   :  { %1276 = vmatpush3.msra.mxu1 %v951_v53 }
 0x11b   :  { %1261 = vmatmul.mubr.msk.f32.gmra.mxu1 %vm74_vm0, %v1456_v33 }
 0x11c   :  { %1277 = vmatprep.mubr.msk.f32.mxu1 %vm74_vm0, %v1435_v18 }
 0x11f   :  { %1278 = vmatmul.mubr.msk.f32.vlgmr.msra.gmra.mxu1 %vm74_vm0, %v1446_v27 }
 0x120   :  { %1280 = vmatprep.mubr.msk.f32.mxu1 %vm74_vm0, %v1449_v28 }
 0x123   :  { %1281 = vmatmul.mubr.msk.f32.gmra.mxu1 %vm74_vm0, %v1456_v33 }
 0x1b7   :  { %v1209_v54 = vpop.f32.mrf.mxu1 }
 0x1b8   :  { %389 = vst.msk [vmem:[#allocation9 + $0x8] sm:$0xff] %vm268_vm1, %v1209_v54 }
 0x1b9   :  { %v369_v55 = vpop.f32.mrf.mxu1 }
 0x1ba   :  { %388 = vst.msk [vmem:[#allocation9] sm:$0xff] %vm268_vm1, %v369_v55 }
 0x1bb   :  { %v1212_v56 = vpop.f32.mrf.mxu1 }
 0x1bc   :  { %391 = vst.msk [vmem:[#allocation9 + $0x18] sm:$0xff] %vm268_vm1, %v1212_v56 }
 0x1bd   :  { %v379_v57 = vpop.f32.mrf.mxu1 }
 0x1be   :  { %390 = vst.msk [vmem:[#allocation9 + $0x10] sm:$0xff] %vm268_vm1, %v379_v57 }
 0x1bf   :  { %v1219_v58 = vpop.f32.mrf.mxu1 }
 0x1c0   :  { %482 = vst.msk [vmem:[#allocation9 + $0x28] sm:$0xff] %vm268_vm1, %v1219_v58 }
 0x1c1   :  { %v461_v59 = vpop.f32.mrf.mxu1 }
 0x1c2   :  { %481 = vst.msk [vmem:[#allocation9 + $0x20] sm:$0xff] %vm268_vm1, %v461_v59 }
 0x1c3   :  { %v1222_v60 = vpop.f32.mrf.mxu1 }
 0x1c4   :  { %484 = vst.msk [vmem:[#allocation9 + $0x38] sm:$0xff] %vm268_vm1, %v1222_v60 }
 0x1c5   :  { %v471_v61 = vpop.f32.mrf.mxu1 }
 0x1c6   :  { %483 = vst.msk [vmem:[#allocation9 + $0x30] sm:$0xff] %vm268_vm1, %v471_v61 }
 0x1c7   :  { %v1229_v62 = vpop.f32.mrf.mxu1 }
 0x1c8   :  { %575 = vst.msk [vmem:[#allocation9 + $0x48] sm:$0xff] %vm268_vm1, %v1229_v62 }
 0x1c9   :  { %v554_v63 = vpop.f32.mrf.mxu1  ;;  %v1249_v0 = vpop.f32.mrf.mxu0 }
 0x1ca   :  { %574 = vst.msk [vmem:[#allocation9 + $0x40] sm:$0xff] %vm268_vm1, %v554_v63  ;;  %761 = vst.msk [vmem:[#allocation9 + $0x88] sm:$0xff] %vm268_vm1, %v1249_v0 }
 0x1cb   :  { %v1232_v1 = vpop.f32.mrf.mxu1  ;;  %v740_v2 = vpop.f32.mrf.mxu0 }
 0x1cc   :  { %577 = vst.msk [vmem:[#allocation9 + $0x58] sm:$0xff] %vm268_vm1, %v1232_v1  ;;  %760 = vst.msk [vmem:[#allocation9 + $0x80] sm:$0xff] %vm268_vm1, %v740_v2 }
 0x1cd   :  { %v564_v3 = vpop.f32.mrf.mxu1 }
 0x1ce   :  { %576 = vst.msk [vmem:[#allocation9 + $0x50] sm:$0xff] %vm268_vm1, %v564_v3  ;;  %v1252_v4 = vpop.f32.mrf.mxu0 }
 0x1cf   :  { %v1239_v5 = vpop.f32.mrf.mxu1  ;;  %763 = vst.msk [vmem:[#allocation9 + $0x98] sm:$0xff] %vm268_vm1, %v1252_v4 }
 0x1d0   :  { %668 = vst.msk [vmem:[#allocation9 + $0x68] sm:$0xff] %vm268_vm1, %v1239_v5  ;;  %v750_v6 = vpop.f32.mrf.mxu0 }
 0x1d1   :  { %v647_v7 = vpop.f32.mrf.mxu1  ;;  %762 = vst.msk [vmem:[#allocation9 + $0x90] sm:$0xff] %vm268_vm1, %v750_v6 }
 0x1d2   :  { %667 = vst.msk [vmem:[#allocation9 + $0x60] sm:$0xff] %vm268_vm1, %v647_v7  ;;  %v1269_v8 = vpop.f32.mrf.mxu0 }
 0x1d3   :  { %v1242_v9 = vpop.f32.mrf.mxu1  ;;  %947 = vst.msk [vmem:[#allocation9 + $0xc8] sm:$0xff] %vm268_vm1, %v1269_v8 }
 0x1d4   :  { %670 = vst.msk [vmem:[#allocation9 + $0x78] sm:$0xff] %vm268_vm1, %v1242_v9  ;;  %v926_v10 = vpop.f32.mrf.mxu0 }
 0x1d5   :  { %v657_v11 = vpop.f32.mrf.mxu1  ;;  %946 = vst.msk [vmem:[#allocation9 + $0xc0] sm:$0xff] %vm268_vm1, %v926_v10 }
 0x1d6   :  { %669 = vst.msk [vmem:[#allocation9 + $0x70] sm:$0xff] %vm268_vm1, %v657_v11  ;;  %v1272_v12 = vpop.f32.mrf.mxu0 }
 0x1d7   :  { %v1259_v13 = vpop.f32.mrf.mxu1  ;;  %949 = vst.msk [vmem:[#allocation9 + $0xd8] sm:$0xff] %vm268_vm1, %v1272_v12 }
 0x1d8   :  { %854 = vst.msk [vmem:[#allocation9 + $0xa8] sm:$0xff] %vm268_vm1, %v1259_v13  ;;  %v936_v14 = vpop.f32.mrf.mxu0 }
 0x1d9   :  { %v833_v15 = vpop.f32.mrf.mxu1  ;;  %948 = vst.msk [vmem:[#allocation9 + $0xd0] sm:$0xff] %vm268_vm1, %v936_v14 }
 0x1da   :  { %853 = vst.msk [vmem:[#allocation9 + $0xa0] sm:$0xff] %vm268_vm1, %v833_v15 }
 0x1db   :  { %v1262_v16 = vpop.f32.mrf.mxu1 }
 0x1dc   :  { %856 = vst.msk [vmem:[#allocation9 + $0xb8] sm:$0xff] %vm268_vm1, %v1262_v16 }
 0x1dd   :  { %v843_v17 = vpop.f32.mrf.mxu1 }
 0x1de   :  { %855 = vst.msk [vmem:[#allocation9 + $0xb0] sm:$0xff] %vm268_vm1, %v843_v17 }
 0x1df   :  { %v1279_v18 = vpop.f32.mrf.mxu1 }
 0x1e0   :  { %1040 = vst.msk [vmem:[#allocation9 + $0xe8] sm:$0xff] %vm268_vm1, %v1279_v18 }
 0x1e1   :  { %v1019_v19 = vpop.f32.mrf.mxu1 }
 0x1e2   :  { %1039 = vst.msk [vmem:[#allocation9 + $0xe0] sm:$0xff] %vm268_vm1, %v1019_v19 }
 0x1e3   :  { %v1282_v20 = vpop.f32.mrf.mxu1 }
 0x1e4   :  { %1042 = vst.msk [vmem:[#allocation9 + $0xf8] sm:$0xff] %vm268_vm1, %v1282_v20 }
 0x1e5   :  { %v1029_v21 = vpop.f32.mrf.mxu1 }
 0x1e6   :  { %1041 = vst.msk [vmem:[#allocation9 + $0xf0] sm:$0xff] %vm268_vm1, %v1029_v21 }
 0x1e7   :  { %1360 = shalt.err (!%p1357_p5)
}
 0x1e8   :  { %1054 = dma.vmem_to_hbm [thread:$0]  %s1049_s2, 4096, %s1564_s3, [#allocation5], %s1377_s17, %s1377_s17, %s1378_s18  }
 0x1e9   :  { %1373 = dma.done.wait [#allocation5], 4096  }
 0x1ea   :  { %1374 = vsyncadd [#allocation5], 4294963200 }
 0x1eb   :  { %1058 = vsyncpa [#allocation4], 1 }
 0x1ec   :  { %1059 = vsyncpa [#allocation7], 1 }
 0x1ed   :  { %1060 = vsyncpa [#allocation5], 1 }

// kernel: upsample.1
= control target key start
LH: loop header
LB: loop body
LE: loop exit
PB: predicated region body
PF: predicated region fallthrough
CT: control target
= control target key end

     0   :  { %8 = vsyncpa [#allocation4], 0  ;;  %s1561_s0 = inlined_call_operand.hbm [shape: f32[128,16], index: 0, kind: input, shape index: {}]   ;;  %s1562_s1 = inlined_call_operand.hbm [shape: f32[16,32], index: 1, kind: input, shape index: {}]   ;;  %s1563_s2 = inlined_call_operand.hbm [shape: f32[32,16], index: 2, kind: input, shape index: {}]   ;;  %s1564_s3 = inlined_call_operand.hbm [shape: f32[256,32], index: 3, kind: output, shape index: {}]  }
   0x1   :  { %9 = vsyncpa [#allocation7], 0 }
   0x2   :  { %10 = vsyncpa [#allocation5], 0  ;;  %s1375_s12 = smov [#allocation6]   ;;  %s1376_s14 = smov [#allocation3]  }
   0x3   :  { %s28_s13 = sshll.u32 %s1375_s12, 4  ;;  %s16_s15 = sshll.u32 %s1376_s14, 4  ;;  %s29_s13 = int_to_ptr.vmem [resolvable:$true] %s28_s13  ;;  %s17_s15 = int_to_ptr.vmem [resolvable:$true] %s16_s15 }
   0x4   :  { %s1297_s16 = scalar_lea.vmem %s29_s13, 256  ;;  %p1302_p1 = scmp.lt.s32.totalorder %s29_s13, %s29_s13 }
   0x5   :  { %p1298_p0 = scmp.ne.s32.totalorder %s29_s13, %s1297_s16  ;;  %p1303_p2 = scmp.lt.s32.totalorder %s1297_s16, %s1297_s16 }
   0x7   :  { %p1304_p3 = por %p1303_p2, %p1302_p1 }
   0x9   :  { %p1305_p4 = pnand %p1304_p3, %p1298_p0 }
   0xb   :  { %1308 = shalt.err (!%p1305_p4)
}
   0xc   :  { %s1377_s17 = smov 128   ;;  %s1378_s18 = smov 8  }
   0xd   :  { %34 = dma.hbm_to_vmem [thread:$0]  %s1562_s1, 256, %s29_s13, [#allocation7], %s1377_s17, %s1377_s17, %s1378_s18  }
   0xe   :  { %s1317_s21 = scalar_lea.vmem %s17_s15, 2048  ;;  %p1322_p6 = scmp.lt.s32.totalorder %s17_s15, %s17_s15 }
   0xf   :  { %p1318_p5 = scmp.ne.s32.totalorder %s17_s15, %s1317_s21  ;;  %p1323_p7 = scmp.lt.s32.totalorder %s1317_s21, %s1317_s21 }
  0x11   :  { %p1324_p8 = por %p1323_p7, %p1322_p6 }
  0x13   :  { %p1325_p9 = pnand %p1324_p8, %p1318_p5 }
  0x15   :  { %1328 = shalt.err (!%p1325_p9)
}
  0x16   :  { %22 = dma.hbm_to_vmem [thread:$0]  %s1561_s0, 2048, %s17_s15, [#allocation4], %s1377_s17, %s1377_s17, %s1378_s18  }
  0x17   :  { %s1379_s24 = smov [#allocation8]  }
  0x18   :  { %s40_s25 = sshll.u32 %s1379_s24, 4  ;;  %s41_s25 = int_to_ptr.vmem [resolvable:$true] %s40_s25 }
  0x19   :  { %s1337_s26 = scalar_lea.vmem %s41_s25, 512  ;;  %p1342_p11 = scmp.lt.s32.totalorder %s41_s25, %s41_s25 }
  0x1a   :  { %p1338_p10 = scmp.ne.s32.totalorder %s41_s25, %s1337_s26  ;;  %p1343_p12 = scmp.lt.s32.totalorder %s1337_s26, %s1337_s26 }
  0x1c   :  { %p1344_p13 = por %p1343_p12, %p1342_p11 }
  0x1e   :  { %p1345_p0 = pnand %p1344_p13, %p1338_p10 }
  0x20   :  { %1348 = shalt.err (!%p1345_p0)
}
  0x21   :  { %46 = dma.hbm_to_vmem [thread:$0]  %s1563_s2, 512, %s41_s25, [#allocation7], %s1377_s17, %s1377_s17, %s1378_s18  }
  0x22   :  { %1369 = dma.done.wait [#allocation4], 2048  }
  0x23   :  { %1370 = vsyncadd [#allocation4], 4294965248 }
  0x24   :  { %1371 = dma.done.wait [#allocation7], 768  }
  0x25   :  { %1372 = vsyncadd [#allocation7], 4294966528  ;;  %vm74_vm0 = vcmask 130048   ;;  %v73_v0 = vld [vmem:[#allocation6 + $0x8] sm:$0xff]  ;;  %v72_v1 = vld [vmem:[#allocation6] sm:$0xff]  ;;  %vm268_vm1 = vcmask 261120  }
  0x26   :  { %v56_v2 = vld [vmem:[#allocation3] sm:$0xff]  ;;  %1175 = vmatprep.subr.mxu0 %v73_v0  ;;  %v57_v3 = vld [vmem:[#allocation3 + $0x8] sm:$0xff]  ;;  %v58_v4 = vld [vmem:[#allocation3 + $0x10] sm:$0xff]  ;;  %s1380_s0 = smov [#allocation9]  }
  0x27   :  { %1179 = vmatprep.mubr.msk.f32.mxu0 %vm74_vm0, %v56_v2  ;;  %1176 = vmatpush3.msra.mxu0 %v73_v0  ;;  %v59_v5 = vld [vmem:[#allocation3 + $0x18] sm:$0xff]  ;;  %v60_v6 = vld [vmem:[#allocation3 + $0x20] sm:$0xff]  ;;  %v61_v7 = vld [vmem:[#allocation3 + $0x28] sm:$0xff]  ;;  %s1048_s2 = sshll.u32 %s1380_s0, 4  ;;  %s1049_s2 = int_to_ptr.vmem [resolvable:$true] %s1048_s2 }
  0x28   :  { %1177 = vmatprep.subr.mxu0 %v72_v1  ;;  %v62_v8 = vld [vmem:[#allocation3 + $0x30] sm:$0xff]  ;;  %v63_v9 = vld [vmem:[#allocation3 + $0x38] sm:$0xff]  ;;  %v64_v10 = vld [vmem:[#allocation3 + $0x40] sm:$0xff]  ;;  %s1349_s28 = scalar_lea.vmem %s1049_s2, 4096  ;;  %p1354_p2 = scmp.lt.s32.totalorder %s1049_s2, %s1049_s2 }
  0x29   :  { %1178 = vmatpush3.msra.mxu0 %v72_v1  ;;  %v65_v11 = vld [vmem:[#allocation3 + $0x48] sm:$0xff]  ;;  %v66_v12 = vld [vmem:[#allocation3 + $0x50] sm:$0xff]  ;;  %v67_v13 = vld [vmem:[#allocation3 + $0x58] sm:$0xff]  ;;  %p1350_p1 = scmp.ne.s32.totalorder %s1049_s2, %s1349_s28  ;;  %p1355_p3 = scmp.lt.s32.totalorder %s1349_s28, %s1349_s28 }
  0x2a   :  { %1180 = vmatmul.mubr.msk.f32.vlgmr.msra.gmra.mxu0 %vm74_vm0, %v57_v3  ;;  %v68_v14 = vld [vmem:[#allocation3 + $0x60] sm:$0xff]  ;;  %v69_v15 = vld [vmem:[#allocation3 + $0x68] sm:$0xff]  ;;  %v70_v16 = vld [vmem:[#allocation3 + $0x70] sm:$0xff] }
  0x2b   :  { %1182 = vmatprep.mubr.msk.f32.mxu0 %vm74_vm0, %v58_v4  ;;  %v71_v17 = vld [vmem:[#allocation3 + $0x78] sm:$0xff]  ;;  %v1435_v18 = vld [vmem:[#allocation8] sm:$0xff]  ;;  %v1449_v28 = vld [vmem:[#allocation8 + $0x10] sm:$0xff]  ;;  %p1356_p4 = por %p1355_p3, %p1354_p2 }
  0x2c   :  { %1207 = vmatprep.mubr.msk.f32.mxu1 %vm74_vm0, %v1435_v18  ;;  %v1446_v27 = vld [vmem:[#allocation8 + $0x8] sm:$0xff]  ;;  %v1456_v33 = vld [vmem:[#allocation8 + $0x18] sm:$0xff] }
  0x2d   :  { %p1357_p5 = pnand %p1356_p4, %p1350_p1 }
  0x2e   :  { %1183 = vmatmul.mubr.msk.f32.gmra.mxu0 %vm74_vm0, %v59_v5 }
  0x2f   :  { %1185 = vmatprep.mubr.msk.f32.mxu0 %vm74_vm0, %v60_v6 }
  0x32   :  { %1186 = vmatmul.mubr.msk.f32.gmra.mxu0 %vm74_vm0, %v61_v7 }
  0x33   :  { %1188 = vmatprep.mubr.msk.f32.mxu0 %vm74_vm0, %v62_v8 }
  0x36   :  { %1189 = vmatmul.mubr.msk.f32.gmra.mxu0 %vm74_vm0, %v63_v9 }
  0x37   :  { %1191 = vmatprep.mubr.msk.f32.mxu0 %vm74_vm0, %v64_v10 }
  0x3a   :  { %1192 = vmatmul.mubr.msk.f32.gmra.mxu0 %vm74_vm0, %v65_v11 }
  0x3b   :  { %1194 = vmatprep.mubr.msk.f32.mxu0 %vm74_vm0, %v66_v12 }
  0x3e   :  { %1195 = vmatmul.mubr.msk.f32.gmra.mxu0 %vm74_vm0, %v67_v13 }
  0x3f   :  { %1197 = vmatprep.mubr.msk.f32.mxu0 %vm74_vm0, %v68_v14 }
  0x42   :  { %1198 = vmatmul.mubr.msk.f32.gmra.mxu0 %vm74_vm0, %v69_v15 }
  0x43   :  { %1200 = vmatprep.mubr.msk.f32.mxu0 %vm74_vm0, %v70_v16 }
  0x46   :  { %1201 = vmatmul.mubr.msk.f32.gmra.mxu0 %vm74_vm0, %v71_v17 }
  0x47   :  { %1247 = vmatprep.mubr.msk.f32.mxu0 %vm74_vm0, %v1435_v18 }
  0xea   :  { %v1181_v19 = vpop.f32.mrf.mxu0 }
  0xeb   :  { %270 = vst.msk [vmem:[#allocation2 + $0x8] sm:$0xff] %vm268_vm1, %v1181_v19 }
  0xec   :  { %v189_v20 = vpop.f32.mrf.mxu0 }
  0xed   :  { %269 = vst.msk [vmem:[#allocation2] sm:$0xff] %vm268_vm1, %v189_v20 }
  0xee   :  { %v1184_v21 = vpop.f32.mrf.mxu0 }
  0xef   :  { %272 = vst.msk [vmem:[#allocation2 + $0x18] sm:$0xff] %vm268_vm1, %v1184_v21 }
  0xf0   :  { %v199_v22 = vpop.f32.mrf.mxu0 }
  0xf1   :  { %271 = vst.msk [vmem:[#allocation2 + $0x10] sm:$0xff] %vm268_vm1, %v199_v22 }
  0xf2   :  { %v1187_v23 = vpop.f32.mrf.mxu0  ;;  %v290_v24 = vld [vmem:[#allocation2 + $0x8] sm:$0xff] }
  0xf3   :  { %274 = vst.msk [vmem:[#allocation2 + $0x28] sm:$0xff] %vm268_vm1, %v1187_v23  ;;  %1203 = vmatprep.subr.mxu1 %v290_v24 }
  0xf4   :  { %v209_v25 = vpop.f32.mrf.mxu0  ;;  %1204 = vmatpush3.msra.mxu1 %v290_v24  ;;  %v289_v26 = vld [vmem:[#allocation2] sm:$0xff] }
  0xf5   :  { %273 = vst.msk [vmem:[#allocation2 + $0x20] sm:$0xff] %vm268_vm1, %v209_v25  ;;  %1205 = vmatprep.subr.mxu1 %v289_v26 }
  0xf6   :  { %v1190_v29 = vpop.f32.mrf.mxu0  ;;  %1206 = vmatpush3.msra.mxu1 %v289_v26  ;;  %v394_v30 = vld [vmem:[#allocation2 + $0x18] sm:$0xff] }
  0xf7   :  { %276 = vst.msk [vmem:[#allocation2 + $0x38] sm:$0xff] %vm268_vm1, %v1190_v29  ;;  %1208 = vmatmul.mubr.msk.f32.vlgmr.msra.gmra.mxu1 %vm74_vm0, %v1446_v27  ;;  %1213 = vmatprep.subr.mxu1 %v394_v30 }
  0xf8   :  { %v219_v31 = vpop.f32.mrf.mxu0  ;;  %1214 = vmatpush3.msra.mxu1 %v394_v30  ;;  %v393_v32 = vld [vmem:[#allocation2 + $0x10] sm:$0xff]  ;;  %1210 = vmatprep.mubr.msk.f32.mxu1 %vm74_vm0, %v1449_v28 }
  0xf9   :  { %275 = vst.msk [vmem:[#allocation2 + $0x30] sm:$0xff] %vm268_vm1, %v219_v31  ;;  %1215 = vmatprep.subr.mxu1 %v393_v32 }
  0xfa   :  { %v1193_v34 = vpop.f32.mrf.mxu0  ;;  %1216 = vmatpush3.msra.mxu1 %v393_v32  ;;  %v487_v35 = vld [vmem:[#allocation2 + $0x28] sm:$0xff] }
  0xfb   :  { %278 = vst.msk [vmem:[#allocation2 + $0x48] sm:$0xff] %vm268_vm1, %v1193_v34  ;;  %1211 = vmatmul.mubr.msk.f32.gmra.mxu1 %vm74_vm0, %v1456_v33  ;;  %1223 = vmatprep.subr.mxu1 %v487_v35 }
  0xfc   :  { %v229_v36 = vpop.f32.mrf.mxu0  ;;  %1217 = vmatprep.mubr.msk.f32.mxu1 %vm74_vm0, %v1435_v18  ;;  %v486_v37 = vld [vmem:[#allocation2 + $0x20] sm:$0xff] }
  0xfd   :  { %277 = vst.msk [vmem:[#allocation2 + $0x40] sm:$0xff] %vm268_vm1, %v229_v36 }
  0xfe   :  { %v1196_v38 = vpop.f32.mrf.mxu0  ;;  %v580_v39 = vld [vmem:[#allocation2 + $0x38] sm:$0xff] }
  0xff   :  { %1218 = vmatmul.mubr.msk.f32.vlgmr.msra.gmra.mxu1 %vm74_vm0, %v1446_v27  ;;  %280 = vst.msk [vmem:[#allocation2 + $0x58] sm:$0xff] %vm268_vm1, %v1196_v38 }
 0x100   :  { %1224 = vmatpush3.msra.mxu1 %v487_v35  ;;  %1220 = vmatprep.mubr.msk.f32.mxu1 %vm74_vm0, %v1449_v28  ;;  %v239_v40 = vpop.f32.mrf.mxu0  ;;  %v579_v45 = vld [vmem:[#allocation2 + $0x30] sm:$0xff] }
 0x101   :  { %1225 = vmatprep.subr.mxu1 %v486_v37  ;;  %279 = vst.msk [vmem:[#allocation2 + $0x50] sm:$0xff] %vm268_vm1, %v239_v40 }
 0x102   :  { %1226 = vmatpush3.msra.mxu1 %v486_v37  ;;  %v673_v41 = vld [vmem:[#allocation2 + $0x48] sm:$0xff]  ;;  %v1199_v42 = vpop.f32.mrf.mxu0 }
 0x103   :  { %1233 = vmatprep.subr.mxu1 %v580_v39  ;;  %1221 = vmatmul.mubr.msk.f32.gmra.mxu1 %vm74_vm0, %v1456_v33  ;;  %282 = vst.msk [vmem:[#allocation2 + $0x68] sm:$0xff] %vm268_vm1, %v1199_v42 }
 0x104   :  { %1243 = vmatprep.subr.mxu0 %v673_v41  ;;  %v672_v43 = vld [vmem:[#allocation2 + $0x40] sm:$0xff]  ;;  %1227 = vmatprep.mubr.msk.f32.mxu1 %vm74_vm0, %v1435_v18  ;;  %v249_v44 = vpop.f32.mrf.mxu0 }
 0x105   :  { %1244 = vmatpush3.msra.mxu0 %v673_v41  ;;  %281 = vst.msk [vmem:[#allocation2 + $0x60] sm:$0xff] %vm268_vm1, %v249_v44 }
 0x106   :  { %1245 = vmatprep.subr.mxu0 %v672_v43  ;;  %v1202_v46 = vpop.f32.mrf.mxu0  ;;  %v766_v47 = vld [vmem:[#allocation2 + $0x58] sm:$0xff] }
 0x107   :  { %1246 = vmatpush3.msra.mxu0 %v672_v43  ;;  %1228 = vmatmul.mubr.msk.f32.vlgmr.msra.gmra.mxu1 %vm74_vm0, %v1446_v27  ;;  %284 = vst.msk [vmem:[#allocation2 + $0x78] sm:$0xff] %vm268_vm1, %v1202_v46 }
 0x108   :  { %1234 = vmatpush3.msra.mxu1 %v580_v39  ;;  %1230 = vmatprep.mubr.msk.f32.mxu1 %vm74_vm0, %v1449_v28  ;;  %v259_v48 = vpop.f32.mrf.mxu0  ;;  %v765_v51 = vld [vmem:[#allocation2 + $0x50] sm:$0xff] }
 0x109   :  { %1235 = vmatprep.subr.mxu1 %v579_v45  ;;  %283 = vst.msk [vmem:[#allocation2 + $0x70] sm:$0xff] %vm268_vm1, %v259_v48  ;;  %1248 = vmatmul.mubr.msk.f32.vlgmr.msra.gmra.mxu0 %vm74_vm0, %v1446_v27 }
 0x10a   :  { %1236 = vmatpush3.msra.mxu1 %v579_v45  ;;  %v859_v49 = vld [vmem:[#allocation2 + $0x68] sm:$0xff]  ;;  %1250 = vmatprep.mubr.msk.f32.mxu0 %vm74_vm0, %v1449_v28 }
 0x10b   :  { %1231 = vmatmul.mubr.msk.f32.gmra.mxu1 %vm74_vm0, %v1456_v33  ;;  %1253 = vmatprep.subr.mxu1 %v766_v47 }
 0x10c   :  { %1237 = vmatprep.mubr.msk.f32.mxu1 %vm74_vm0, %v1435_v18  ;;  %1263 = vmatprep.subr.mxu0 %v859_v49  ;;  %v858_v50 = vld [vmem:[#allocation2 + $0x60] sm:$0xff] }
 0x10d   :  { %1264 = vmatpush3.msra.mxu0 %v859_v49 }
 0x10e   :  { %1265 = vmatprep.subr.mxu0 %v858_v50  ;;  %1251 = vmatmul.mubr.msk.f32.gmra.mxu0 %vm74_vm0, %v1456_v33  ;;  %v952_v52 = vld [vmem:[#allocation2 + $0x78] sm:$0xff] }
 0x10f   :  { %1238 = vmatmul.mubr.msk.f32.vlgmr.msra.gmra.mxu1 %vm74_vm0, %v1446_v27  ;;  %1266 = vmatpush3.msra.mxu0 %v858_v50 }
 0x110   :  { %1254 = vmatpush3.msra.mxu1 %v766_v47  ;;  %1240 = vmatprep.mubr.msk.f32.mxu1 %vm74_vm0, %v1449_v28  ;;  %v951_v53 = vld [vmem:[#allocation2 + $0x70] sm:$0xff] }
 0x111   :  { %1255 = vmatprep.subr.mxu1 %v765_v51  ;;  %1267 = vmatprep.mubr.msk.f32.mxu0 %vm74_vm0, %v1435_v18 }
 0x112   :  { %1256 = vmatpush3.msra.mxu1 %v765_v51  ;;  %1268 = vmatmul.mubr.msk.f32.vlgmr.msra.gmra.mxu0 %vm74_vm0, %v1446_v27 }
 0x113   :  { %1241 = vmatmul.mubr.msk.f32.gmra.mxu1 %vm74_vm0, %v1456_v33  ;;  %1273 = vmatprep.subr.mxu1 %v952_v52 }
 0x114   :  { %1257 = vmatprep.mubr.msk.f32.mxu1 %vm74_vm0, %v1435_v18  ;;  %1270 = vmatprep.mubr.msk.f32.mxu0 %vm74_vm0, %v1449_v28 }
 0x116   :  { %1271 = vmatmul.mubr.msk.f32.gmra.mxu0 %vm74_vm0, %v1456_v33 }
 0x117   :  { %1258 = vmatmul.mubr.msk.f32.vlgmr.msra.gmra.mxu1 %vm74_vm0, %v1446_v27 }
 0x118   :  { %1274 = vmatpush3.msra.mxu1 %v952_v52  ;;  %1260 = vmatprep.mubr.msk.f32.mxu1 %vm74_vm0, %v1449_v28 }
 0x119   :  { %1275 = vmatprep.subr.mxu1 %v951_v53 }
 0x11a   :  { %1276 = vmatpush3.msra.mxu1 %v951_v53 }
 0x11b   :  { %1261 = vmatmul.mubr.msk.f32.gmra.mxu1 %vm74_vm0, %v1456_v33 }
 0x11c   :  { %1277 = vmatprep.mubr.msk.f32.mxu1 %vm74_vm0, %v1435_v18 }
 0x11f   :  { %1278 = vmatmul.mubr.msk.f32.vlgmr.msra.gmra.mxu1 %vm74_vm0, %v1446_v27 }
 0x120   :  { %1280 = vmatprep.mubr.msk.f32.mxu1 %vm74_vm0, %v1449_v28 }
 0x123   :  { %1281 = vmatmul.mubr.msk.f32.gmra.mxu1 %vm74_vm0, %v1456_v33 }
 0x1b7   :  { %v1209_v54 = vpop.f32.mrf.mxu1 }
 0x1b8   :  { %389 = vst.msk [vmem:[#allocation9 + $0x8] sm:$0xff] %vm268_vm1, %v1209_v54 }
 0x1b9   :  { %v369_v55 = vpop.f32.mrf.mxu1 }
 0x1ba   :  { %388 = vst.msk [vmem:[#allocation9] sm:$0xff] %vm268_vm1, %v369_v55 }
 0x1bb   :  { %v1212_v56 = vpop.f32.mrf.mxu1 }
 0x1bc   :  { %391 = vst.msk [vmem:[#allocation9 + $0x18] sm:$0xff] %vm268_vm1, %v1212_v56 }
 0x1bd   :  { %v379_v57 = vpop.f32.mrf.mxu1 }
 0x1be   :  { %390 = vst.msk [vmem:[#allocation9 + $0x10] sm:$0xff] %vm268_vm1, %v379_v57 }
 0x1bf   :  { %v1219_v58 = vpop.f32.mrf.mxu1 }
 0x1c0   :  { %482 = vst.msk [vmem:[#allocation9 + $0x28] sm:$0xff] %vm268_vm1, %v1219_v58 }
 0x1c1   :  { %v461_v59 = vpop.f32.mrf.mxu1 }
 0x1c2   :  { %481 = vst.msk [vmem:[#allocation9 + $0x20] sm:$0xff] %vm268_vm1, %v461_v59 }
 0x1c3   :  { %v1222_v60 = vpop.f32.mrf.mxu1 }
 0x1c4   :  { %484 = vst.msk [vmem:[#allocation9 + $0x38] sm:$0xff] %vm268_vm1, %v1222_v60 }
 0x1c5   :  { %v471_v61 = vpop.f32.mrf.mxu1 }
 0x1c6   :  { %483 = vst.msk [vmem:[#allocation9 + $0x30] sm:$0xff] %vm268_vm1, %v471_v61 }
 0x1c7   :  { %v1229_v62 = vpop.f32.mrf.mxu1 }
 0x1c8   :  { %575 = vst.msk [vmem:[#allocation9 + $0x48] sm:$0xff] %vm268_vm1, %v1229_v62 }
 0x1c9   :  { %v554_v63 = vpop.f32.mrf.mxu1  ;;  %v1249_v0 = vpop.f32.mrf.mxu0 }
 0x1ca   :  { %574 = vst.msk [vmem:[#allocation9 + $0x40] sm:$0xff] %vm268_vm1, %v554_v63  ;;  %761 = vst.msk [vmem:[#allocation9 + $0x88] sm:$0xff] %vm268_vm1, %v1249_v0 }
 0x1cb   :  { %v1232_v1 = vpop.f32.mrf.mxu1  ;;  %v740_v2 = vpop.f32.mrf.mxu0 }
 0x1cc   :  { %577 = vst.msk [vmem:[#allocation9 + $0x58] sm:$0xff] %vm268_vm1, %v1232_v1  ;;  %760 = vst.msk [vmem:[#allocation9 + $0x80] sm:$0xff] %vm268_vm1, %v740_v2 }
 0x1cd   :  { %v564_v3 = vpop.f32.mrf.mxu1 }
 0x1ce   :  { %576 = vst.msk [vmem:[#allocation9 + $0x50] sm:$0xff] %vm268_vm1, %v564_v3  ;;  %v1252_v4 = vpop.f32.mrf.mxu0 }
 0x1cf   :  { %v1239_v5 = vpop.f32.mrf.mxu1  ;;  %763 = vst.msk [vmem:[#allocation9 + $0x98] sm:$0xff] %vm268_vm1, %v1252_v4 }
 0x1d0   :  { %668 = vst.msk [vmem:[#allocation9 + $0x68] sm:$0xff] %vm268_vm1, %v1239_v5  ;;  %v750_v6 = vpop.f32.mrf.mxu0 }
 0x1d1   :  { %v647_v7 = vpop.f32.mrf.mxu1  ;;  %762 = vst.msk [vmem:[#allocation9 + $0x90] sm:$0xff] %vm268_vm1, %v750_v6 }
 0x1d2   :  { %667 = vst.msk [vmem:[#allocation9 + $0x60] sm:$0xff] %vm268_vm1, %v647_v7  ;;  %v1269_v8 = vpop.f32.mrf.mxu0 }
 0x1d3   :  { %v1242_v9 = vpop.f32.mrf.mxu1  ;;  %947 = vst.msk [vmem:[#allocation9 + $0xc8] sm:$0xff] %vm268_vm1, %v1269_v8 }
 0x1d4   :  { %670 = vst.msk [vmem:[#allocation9 + $0x78] sm:$0xff] %vm268_vm1, %v1242_v9  ;;  %v926_v10 = vpop.f32.mrf.mxu0 }
 0x1d5   :  { %v657_v11 = vpop.f32.mrf.mxu1  ;;  %946 = vst.msk [vmem:[#allocation9 + $0xc0] sm:$0xff] %vm268_vm1, %v926_v10 }
 0x1d6   :  { %669 = vst.msk [vmem:[#allocation9 + $0x70] sm:$0xff] %vm268_vm1, %v657_v11  ;;  %v1272_v12 = vpop.f32.mrf.mxu0 }
 0x1d7   :  { %v1259_v13 = vpop.f32.mrf.mxu1  ;;  %949 = vst.msk [vmem:[#allocation9 + $0xd8] sm:$0xff] %vm268_vm1, %v1272_v12 }
 0x1d8   :  { %854 = vst.msk [vmem:[#allocation9 + $0xa8] sm:$0xff] %vm268_vm1, %v1259_v13  ;;  %v936_v14 = vpop.f32.mrf.mxu0 }
 0x1d9   :  { %v833_v15 = vpop.f32.mrf.mxu1  ;;  %948 = vst.msk [vmem:[#allocation9 + $0xd0] sm:$0xff] %vm268_vm1, %v936_v14 }
 0x1da   :  { %853 = vst.msk [vmem:[#allocation9 + $0xa0] sm:$0xff] %vm268_vm1, %v833_v15 }
 0x1db   :  { %v1262_v16 = vpop.f32.mrf.mxu1 }
 0x1dc   :  { %856 = vst.msk [vmem:[#allocation9 + $0xb8] sm:$0xff] %vm268_vm1, %v1262_v16 }
 0x1dd   :  { %v843_v17 = vpop.f32.mrf.mxu1 }
 0x1de   :  { %855 = vst.msk [vmem:[#allocation9 + $0xb0] sm:$0xff] %vm268_vm1, %v843_v17 }
 0x1df   :  { %v1279_v18 = vpop.f32.mrf.mxu1 }
 0x1e0   :  { %1040 = vst.msk [vmem:[#allocation9 + $0xe8] sm:$0xff] %vm268_vm1, %v1279_v18 }
 0x1e1   :  { %v1019_v19 = vpop.f32.mrf.mxu1 }
 0x1e2   :  { %1039 = vst.msk [vmem:[#allocation9 + $0xe0] sm:$0xff] %vm268_vm1, %v1019_v19 }
 0x1e3   :  { %v1282_v20 = vpop.f32.mrf.mxu1 }
 0x1e4   :  { %1042 = vst.msk [vmem:[#allocation9 + $0xf8] sm:$0xff] %vm268_vm1, %v1282_v20 }
 0x1e5   :  { %v1029_v21 = vpop.f32.mrf.mxu1 }
 0x1e6   :  { %1041 = vst.msk [vmem:[#allocation9 + $0xf0] sm:$0xff] %vm268_vm1, %v1029_v21 }
 0x1e7   :  { %1360 = shalt.err (!%p1357_p5)
}
 0x1e8   :  { %1054 = dma.vmem_to_hbm [thread:$0]  %s1049_s2, 4096, %s1564_s3, [#allocation5], %s1377_s17, %s1377_s17, %s1378_s18  }
 0x1e9   :  { %1373 = dma.done.wait [#allocation5], 4096  }
 0x1ea   :  { %1374 = vsyncadd [#allocation5], 4294963200 }
 0x1eb   :  { %1058 = vsyncpa [#allocation4], 1 }
 0x1ec   :  { %1059 = vsyncpa [#allocation7], 1 }
 0x1ed   :  { %1060 = vsyncpa [#allocation5], 1 }

</bundles_post_ra>
